<compile_context>
chip_gen: v7x
topology: tpu7x:2x2x1
jax: 0.10.0
libtpu: 0.0.40
codegen_flags: <defaults>
</compile_context>

<pallas_src>
import math

import jax
import jax.numpy as jnp
from jax import lax
from jax.experimental import pallas as pl
from jax.experimental.pallas import tpu as pltpu

N_FFT = 2048
HOP = 512
WIN = 1024
N_BINS = N_FFT // 2 + 1        # 1025 rfft bins
NB_K = N_FFT // 2              # 1024 bins handled in-kernel (8*128, lane-dense)


# ----------------------------- Pallas kernel --------------------------------
def _biquad_freq_filter_kernel(a1_ref, a2_ref, d0_ref, d2_ref,
                               xre_ref, xim_ref, cw_ref, sw_ref,
                               yre_ref, yim_ref):
    # Bin tables (1, NB); 2w terms via double angle (drops two DMA streams).
    cw = cw_ref[...]
    sw = sw_ref[...]
    c2w = 2.0 * cw * cw - 1.0
    s2w = 2.0 * sw * cw

    in_ch = xre_ref.shape[0]

    # Output refs double as per-step accumulators (each grid step owns its block).
    yre_ref[...] = jnp.zeros_like(yre_ref)
    yim_ref[...] = jnp.zeros_like(yim_ref)

    def body(i, carry):
        # Per-frame normalized direct-form coefficients for input channel i.
        # Trailing singleton LANE dim -> expansion over bins is a lane broadcast
        # (no lane->sublane relayout, no XLU traffic).
        a1 = a1_ref[i]                       # (TF, 1)
        a2 = a2_ref[i]
        d0 = d0_ref[i]                       # b0 - 1
        d2 = d2_ref[i]                       # b2 - a2

        # A(w) = 1 + a1 e^{-jw} + a2 e^{-j2w};  b1 == a1  =>  B = A + d0 + d2 e^{-j2w}
        A_re = 1.0 + a1 * cw + a2 * c2w      # (TF, NB)
        A_im = -(a1 * sw + a2 * s2w)
        B_re = A_re + d0 + d2 * c2w
        B_im = A_im - d2 * s2w

        # H = B / A ; approx reciprocal on the (otherwise idle) EUP slot,
        # one Newton refinement for accuracy near sharp resonances.
        den = A_re * A_re + A_im * A_im
        inv = pl.reciprocal(den, approx=True)
        inv = inv * (2.0 - den * inv)
        H_re = (B_re * A_re + B_im * A_im) * inv
        H_im = (B_im * A_re - B_re * A_im) * inv

        # Y += X_i * H_i   (in_ch reduction fused; exact by linearity).
        xre = xre_ref[i]                     # (TF, NB)
        xim = xim_ref[i]
        yre_ref[...] += xre * H_re - xim * H_im
        yim_ref[...] += xre * H_im + xim * H_re
        return carry

    lax.fori_loop(0, in_ch, body, 0, unroll=True)


# -------------------------- tiling / VMEM budgeting --------------------------
def _tpu_vmem_capacity_bytes():
    try:
        return int(pltpu.get_tpu_info().vmem_capacity_bytes)
    except Exception:
        return 64 << 20                      # conservative (v7x per-core VMEM)


def _choose_frame_tile(F, in_ch):
    """Frame tile (multiple of 8) so the double-buffered working set fits VMEM."""
    cap = _tpu_vmem_capacity_bytes()
    budget = min(cap // 3, 24 << 20)
    # per-frame bytes, double-buffered: 2 bufs * (2 X streams * in_ch + 2 Y streams)
    per_frame = 2 * (2 * in_ch + 2) * NB_K * 4
    tf = max(8, (budget // per_frame) // 8 * 8)
    f_pad8 = ((F + 7) // 8) * 8
    return int(min(tf, 256, f_pad8))


def _biquad_filter_freq_domain(a1, a2, d0, d2, x_re, x_im, tf):
    """a1/a2/d0/d2: (batch, out_ch, in_ch, F_pad, 1) f32
       x_re/x_im : (batch, in_ch, F_pad, NB_K) f32
       returns yre, yim: (batch, out_ch, F_pad, NB_K) f32 (summed over in_ch)."""
    batch, out_ch, in_ch, f_pad, _ = a1.shape
    nb = x_re.shape[-1]
    n_ft = f_pad // tf

    k = jnp.arange(nb, dtype=jnp.float32)
    w = 2.0 * jnp.pi * k / float(N_FFT)
    cw = jnp.cos(w).reshape(1, nb)
    sw = jnp.sin(w).reshape(1, nb)

    # Coefficients: one (in_ch, TF, 1) block per (b, frame-tile, o) step.
    coef_spec = pl.BlockSpec((None, None, in_ch, tf, 1),
                             lambda b, f, o: (b, o, 0, f, 0))
    # X depends only on (batch, frame-tile): not re-DMA'd across innermost out_ch.
    x_spec = pl.BlockSpec((None, in_ch, tf, nb), lambda b, f, o: (b, 0, f, 0))
    # Bin tables: constant block, fetched once.
    tbl_spec = pl.BlockSpec((1, nb), lambda b, f, o: (0, 0))
    # Output: lane-dense (TF, 1024) slab per step -> unmasked stores.
    y_spec = pl.BlockSpec((None, None, tf, nb), lambda b, f, o: (b, o, f, 0))

    out_sds = jax.ShapeDtypeStruct((batch, out_ch, f_pad, nb), jnp.float32)

    cap = _tpu_vmem_capacity_bytes()
    vmem_limit = int(min(cap * 3 // 4, 96 << 20))

    yre, yim = pl.pallas_call(
        _biquad_freq_filter_kernel,
        out_shape=(out_sds, out_sds),
        grid_spec=pltpu.PrefetchScalarGridSpec(
            num_scalar_prefetch=0,
            grid=(batch, n_ft, out_ch),
            in_specs=[coef_spec, coef_spec, coef_spec, coef_spec,
                      x_spec, x_spec, tbl_spec, tbl_spec],
            out_specs=[y_spec, y_spec],
        ),
        compiler_params=pltpu.CompilerParams(
            dimension_semantics=("parallel", "parallel", "parallel"),
            vmem_limit_bytes=vmem_limit),
    )(a1, a2, d0, d2, x_re, x_im, cw, sw)
    return yre, yim


# ------------------------------- JAX glue ------------------------------------
def _hann_window(n):
    i = jnp.arange(n, dtype=jnp.float32)
    return 0.5 * (1.0 - jnp.cos(2.0 * jnp.pi * i / n))   # periodic hann (torch default)


def _padded_window():
    win = _hann_window(WIN)
    left = (N_FFT - WIN) // 2
    return jnp.pad(win, (left, N_FFT - WIN - left))


def _stft(x):
    """x: (C, T) -> complex (C, F, N_BINS); matches torch.stft(center=True, reflect)."""
    C, T = x.shape
    pad = N_FFT // 2
    xp = jnp.pad(x, ((0, 0), (pad, pad)), mode="reflect")
    n_frames = 1 + T // HOP
    idx = jnp.arange(n_frames)[:, None] * HOP + jnp.arange(N_FFT)[None, :]
    frames = xp[:, idx] * _padded_window()[None, None, :]
    return jnp.fft.rfft(frames, axis=-1)


def _istft(Y, T):
    """Y: complex (C, F, N_BINS) -> (C, T); matches torch.istft(center=True, length=T)."""
    C, F, _ = Y.shape
    win = _padded_window()
    frames = jnp.fft.irfft(Y, n=N_FFT, axis=-1).astype(jnp.float32) * win[None, None, :]
    pad = N_FFT // 2
    total = N_FFT + (F - 1) * HOP
    pos = (jnp.arange(F)[:, None] * HOP + jnp.arange(N_FFT)[None, :]).reshape(-1)
    y = jnp.zeros((C, total), jnp.float32).at[:, pos].add(frames.reshape(C, -1))
    wsum = jnp.zeros((total,), jnp.float32).at[pos].add(jnp.tile(win * win, F))
    return y[:, pad:pad + T] / jnp.maximum(wsum[pad:pad + T], 1e-11)


def _params_to_direct_form(freq, gain, Q):
    """RBJ peaking-EQ direct-form coefficients, normalized by a0.
    TODO(synk): _params_to_direct_form is abstract in the base class; verify against
    the concrete glotnet subclass's parameterization."""
    omega = jnp.pi * freq
    A = jnp.exp(gain * (math.log(10.0) / 40.0))           # 10 ** (gain / 40)
    sin_om = jnp.sin(omega)
    cos_om = jnp.cos(omega)
    alpha = sin_om / (2.0 * Q)
    inv_a0 = 1.0 / (1.0 + alpha / A)
    b0 = (1.0 + alpha * A) * inv_a0
    b1 = (-2.0 * cos_om) * inv_a0
    b2 = (1.0 - alpha * A) * inv_a0
    a1 = b1                                               # identical after normalization
    a2 = (1.0 - alpha / A) * inv_a0
    return b0, b1, b2, a1, a2


def biquad_forward(x, freq, gain, Q):
    """x: (batch, in_ch, T); freq/gain/Q: (batch, out_ch, in_ch, n_frames)
    Returns y: (batch, out_ch, T)  (== reshape + sum over in_ch, as in the module)."""
    assert freq.ndim == 4 and gain.shape == freq.shape and Q.shape == freq.shape
    batch, out_ch, in_ch, n_frames = freq.shape
    T = x.shape[-1]

    # STFT of x: only batch*in_ch forward transforms (the out_ch broadcast of x is
    # handled by the kernel's X index_map, never materialized).
    X = _stft(x.reshape(batch * in_ch, T))                 # (batch*in_ch, F, 1025)
    F = X.shape[1]
    X = X.reshape(batch, in_ch, F, N_BINS)

    # Align coefficient frames to STFT frames (center padding adds one frame).
    # TODO(synk): exact glotnet LFilter frame-alignment unknown; repeat last frame.
    def _align(p):
        nf = p.shape[-1]
        if F > nf:
            p = jnp.concatenate([p, jnp.repeat(p[..., -1:], F - nf, axis=-1)], axis=-1)
        else:
            p = p[..., :F]
        return p.astype(jnp.float32)

    b0, b1, b2, a1, a2 = _params_to_direct_form(_align(freq), _align(gain), _align(Q))
    d0 = b0 - 1.0            # exploits a1 == b1 inside the kernel
    d2 = b2 - a2

    # Frame tiling (multiple of 8, VMEM-budgeted).
    tf = _choose_frame_tile(F, in_ch)
    f_pad = ((F + tf - 1) // tf) * tf

    def _pad_coef(p):        # (b, o, i, F) -> (b, o, i, f_pad, 1); zero pad => H = 1
        p = jnp.pad(p, ((0, 0), (0, 0), (0, 0), (0, f_pad - F)))
        return p[..., None]

    # In-kernel bins 0..1023 (lane-dense); frame axis zero-padded to f_pad.
    x_re = jnp.pad(jnp.real(X[..., :NB_K]).astype(jnp.float32),
                   ((0, 0), (0, 0), (0, f_pad - F), (0, 0)))
    x_im = jnp.pad(jnp.imag(X[..., :NB_K]).astype(jnp.float32),
                   ((0, 0), (0, 0), (0, f_pad - F), (0, 0)))

    yre, yim = _biquad_filter_freq_domain(_pad_coef(a1), _pad_coef(a2),
                                          _pad_coef(d0), _pad_coef(d2),
                                          x_re, x_im, tf)

    # Nyquist bin (k = N_FFT/2, w = pi): e^{-jw} = -1, e^{-j2w} = +1 -> H is real.
    h_nyq = (b0 - b1 + b2) / (1.0 - a1 + a2)               # (batch, out_ch, in_ch, F)
    y_nyq = jnp.sum(h_nyq * X[:, None, :, :, N_BINS - 1], axis=2)   # (batch, out_ch, F)

    Y = lax.complex(yre[:, :, :F, :], yim[:, :, :F, :])    # (batch, out_ch, F, 1024)
    Y = jnp.concatenate([Y, y_nyq[..., None]], axis=-1)    # (batch, out_ch, F, 1025)
    y = _istft(Y.reshape(batch * out_ch, F, N_BINS), T)    # batch*out_ch inverse FFTs
    return y.reshape(batch, out_ch, T)


# --------------------------------- main ---------------------------------------
if __name__ == "__main__":
    key = jax.random.PRNGKey(0)
    k1, k2, k3, k4 = jax.random.split(key, 4)

    batch, out_ch, in_ch = 2, 3, 2
    T = 2048                     # must be a multiple of hop (512)
    n_frames = T // HOP          # 4

    x = jax.random.normal(k1, (batch, in_ch, T), dtype=jnp.float32)
    freq = jax.random.uniform(k2, (batch, out_ch, in_ch, n_frames),
                              dtype=jnp.float32, minval=0.05, maxval=0.45)
    gain = 6.0 * jax.random.normal(k3, (batch, out_ch, in_ch, n_frames), dtype=jnp.float32)
    Q = jax.random.uniform(k4, (batch, out_ch, in_ch, n_frames),
                           dtype=jnp.float32, minval=0.707, maxval=2.0)

    y = jax.jit(biquad_forward)(x, freq, gain, Q)
    jax.block_until_ready(y)
    assert y.shape == (batch, out_ch, T)
    assert jnp.all(jnp.isfinite(y))
    print("KERNEL_OK")
</pallas_src>

<mosaic_0001>
module attributes {stable_mosaic.version = 11 : i64} {
  func.func private @main(%arg0: i32) attributes {dimension_semantics = [#tpu.dimension_semantics<core_parallel>], iteration_bounds = array<i64: 2>, tpu.core_type = #tpu.core_type<sc_scalar_subcore>, window_params = []} {
    return
  }
}

module attributes {stable_mosaic.version = 11 : i64} {
  func.func private @main(%arg0: i32) attributes {dimension_semantics = [#tpu.dimension_semantics<core_parallel>], iteration_bounds = array<i64: 2>, tpu.core_type = #tpu.core_type<sc_scalar_subcore>, window_params = []} {
    return
  }
}

module attributes {stable_mosaic.version = 11 : i64} {
  func.func @_biquad_freq_filter_kernel(%arg0: i32, %arg1: i32, %arg2: i32, %arg3: memref<1x1x2x8x1xf32, #tpu.memory_space<vmem>>, %arg4: memref<1x1x2x8x1xf32, #tpu.memory_space<vmem>>, %arg5: memref<1x1x2x8x1xf32, #tpu.memory_space<vmem>>, %arg6: memref<1x1x2x8x1xf32, #tpu.memory_space<vmem>>, %arg7: memref<1x2x8x1024xf32, #tpu.memory_space<vmem>>, %arg8: memref<1x2x8x1024xf32, #tpu.memory_space<vmem>>, %arg9: memref<1x1024xf32, #tpu.memory_space<vmem>>, %arg10: memref<1x1024xf32, #tpu.memory_space<vmem>>, %arg11: memref<1x1x8x1024xf32, #tpu.memory_space<vmem>>, %arg12: memref<1x1x8x1024xf32, #tpu.memory_space<vmem>>) attributes {dimension_semantics = [#tpu.dimension_semantics<parallel>, #tpu.dimension_semantics<parallel>, #tpu.dimension_semantics<parallel>], iteration_bounds = array<i64: 2, 1, 3>, scalar_prefetch = 0 : i64, scratch_operands = 0 : i64, tpu.core_type = #tpu.core_type<tc>, window_params = [{transform_indices = @transform_0, window_bounds = array<i64: 1, 1, 2, 8, 1>}, {transform_indices = @transform_1, window_bounds = array<i64: 1, 1, 2, 8, 1>}, {transform_indices = @transform_2, window_bounds = array<i64: 1, 1, 2, 8, 1>}, {transform_indices = @transform_3, window_bounds = array<i64: 1, 1, 2, 8, 1>}, {transform_indices = @transform_4, window_bounds = array<i64: 1, 2, 8, 1024>}, {transform_indices = @transform_5, window_bounds = array<i64: 1, 2, 8, 1024>}, {pipeline_mode = #tpu.pipeline_mode<synchronous>, transform_indices = @transform_6, window_bounds = array<i64: 1, 1024>}, {pipeline_mode = #tpu.pipeline_mode<synchronous>, transform_indices = @transform_7, window_bounds = array<i64: 1, 1024>}, {transform_indices = @transform_8, window_bounds = array<i64: 1, 1, 8, 1024>}, {transform_indices = @transform_9, window_bounds = array<i64: 1, 1, 8, 1024>}]} {
    %c0 = arith.constant 0 : index
    %c0_0 = arith.constant 0 : index
    %0 = vector.load %arg9[%c0, %c0_0] : memref<1x1024xf32, #tpu.memory_space<vmem>>, vector<1x1024xf32>
    %c0_1 = arith.constant 0 : index
    %c0_2 = arith.constant 0 : index
    %1 = vector.load %arg10[%c0_1, %c0_2] : memref<1x1024xf32, #tpu.memory_space<vmem>>, vector<1x1024xf32>
    %cst = arith.constant 2.000000e+00 : f32
    %2 = vector.broadcast %cst : f32 to vector<1x1024xf32>
    %3 = arith.mulf %2, %0 : vector<1x1024xf32>
    %4 = arith.mulf %3, %0 : vector<1x1024xf32>
    %cst_3 = arith.constant 1.000000e+00 : f32
    %5 = vector.broadcast %cst_3 : f32 to vector<1x1024xf32>
    %6 = arith.subf %4, %5 : vector<1x1024xf32>
    %cst_4 = arith.constant 2.000000e+00 : f32
    %7 = vector.broadcast %cst_4 : f32 to vector<1x1024xf32>
    %8 = arith.mulf %7, %1 : vector<1x1024xf32>
    %9 = arith.mulf %8, %0 : vector<1x1024xf32>
    %cst_5 = arith.constant 0.000000e+00 : f32
    %10 = vector.broadcast %cst_5 : f32 to vector<8x1024xf32>
    %c0_6 = arith.constant 0 : index
    %c0_7 = arith.constant 0 : index
    %c0_8 = arith.constant 0 : index
    %c0_9 = arith.constant 0 : index
    %11 = vector.load %arg11[%c0_6, %c0_7, %c0_8, %c0_9] : memref<1x1x8x1024xf32, #tpu.memory_space<vmem>>, vector<1x1x8x1024xf32>
    %12 = vector.shape_cast %11 : vector<1x1x8x1024xf32> to vector<8x1024xf32>
    %13 = vector.shape_cast %10 : vector<8x1024xf32> to vector<1x1x8x1024xf32>
    tpu.vector_store %arg11[%c0_6, %c0_7, %c0_8, %c0_9], %13 {strides = array<i32>} : memref<1x1x8x1024xf32, #tpu.memory_space<vmem>>, vector<1x1x8x1024xf32>,
    %cst_10 = arith.constant 0.000000e+00 : f32
    %14 = vector.broadcast %cst_10 : f32 to vector<8x1024xf32>
    %c0_11 = arith.constant 0 : index
    %c0_12 = arith.constant 0 : index
    %c0_13 = arith.constant 0 : index
    %c0_14 = arith.constant 0 : index
    %15 = vector.load %arg12[%c0_11, %c0_12, %c0_13, %c0_14] : memref<1x1x8x1024xf32, #tpu.memory_space<vmem>>, vector<1x1x8x1024xf32>
    %16 = vector.shape_cast %15 : vector<1x1x8x1024xf32> to vector<8x1024xf32>
    %17 = vector.shape_cast %14 : vector<8x1024xf32> to vector<1x1x8x1024xf32>
    tpu.vector_store %arg12[%c0_11, %c0_12, %c0_13, %c0_14], %17 {strides = array<i32>} : memref<1x1x8x1024xf32, #tpu.memory_space<vmem>>, vector<1x1x8x1024xf32>,
    %c0_i32 = arith.constant 0 : i32
    %c0_15 = arith.constant 0 : index
    %c0_16 = arith.constant 0 : index
    %18 = arith.index_cast %c0_i32 : i32 to index
    %c0_17 = arith.constant 0 : index
    %c0_18 = arith.constant 0 : index
    %19 = vector.load %arg3[%c0_15, %c0_16, %18, %c0_17, %c0_18] : memref<1x1x2x8x1xf32, #tpu.memory_space<vmem>>, vector<1x1x1x8x1xf32>
    %20 = vector.shape_cast %19 : vector<1x1x1x8x1xf32> to vector<8x1xf32>
    %c0_19 = arith.constant 0 : index
    %c0_20 = arith.constant 0 : index
    %21 = arith.index_cast %c0_i32 : i32 to index
    %c0_21 = arith.constant 0 : index
    %c0_22 = arith.constant 0 : index
    %22 = vector.load %arg4[%c0_19, %c0_20, %21, %c0_21, %c0_22] : memref<1x1x2x8x1xf32, #tpu.memory_space<vmem>>, vector<1x1x1x8x1xf32>
    %23 = vector.shape_cast %22 : vector<1x1x1x8x1xf32> to vector<8x1xf32>
    %c0_23 = arith.constant 0 : index
    %c0_24 = arith.constant 0 : index
    %24 = arith.index_cast %c0_i32 : i32 to index
    %c0_25 = arith.constant 0 : index
    %c0_26 = arith.constant 0 : index
    %25 = vector.load %arg5[%c0_23, %c0_24, %24, %c0_25, %c0_26] : memref<1x1x2x8x1xf32, #tpu.memory_space<vmem>>, vector<1x1x1x8x1xf32>
    %26 = vector.shape_cast %25 : vector<1x1x1x8x1xf32> to vector<8x1xf32>
    %c0_27 = arith.constant 0 : index
    %c0_28 = arith.constant 0 : index
    %27 = arith.index_cast %c0_i32 : i32 to index
    %c0_29 = arith.constant 0 : index
    %c0_30 = arith.constant 0 : index
    %28 = vector.load %arg6[%c0_27, %c0_28, %27, %c0_29, %c0_30] : memref<1x1x2x8x1xf32, #tpu.memory_space<vmem>>, vector<1x1x1x8x1xf32>
    %29 = vector.shape_cast %28 : vector<1x1x1x8x1xf32> to vector<8x1xf32>
    %30 = vector.broadcast %20 : vector<8x1xf32> to vector<8x1024xf32>
    %31 = vector.broadcast %0 : vector<1x1024xf32> to vector<8x1024xf32>
    %32 = arith.mulf %30, %31 : vector<8x1024xf32>
    %cst_31 = arith.constant 1.000000e+00 : f32
    %33 = vector.broadcast %cst_31 : f32 to vector<8x1024xf32>
    %34 = arith.addf %33, %32 : vector<8x1024xf32>
    %35 = vector.broadcast %23 : vector<8x1xf32> to vector<8x1024xf32>
    %36 = vector.broadcast %6 : vector<1x1024xf32> to vector<8x1024xf32>
    %37 = arith.mulf %35, %36 : vector<8x1024xf32>
    %38 = arith.addf %34, %37 : vector<8x1024xf32>
    %39 = vector.broadcast %20 : vector<8x1xf32> to vector<8x1024xf32>
    %40 = vector.broadcast %1 : vector<1x1024xf32> to vector<8x1024xf32>
    %41 = arith.mulf %39, %40 : vector<8x1024xf32>
    %42 = vector.broadcast %23 : vector<8x1xf32> to vector<8x1024xf32>
    %43 = vector.broadcast %9 : vector<1x1024xf32> to vector<8x1024xf32>
    %44 = arith.mulf %42, %43 : vector<8x1024xf32>
    %45 = arith.addf %41, %44 : vector<8x1024xf32>
    %cst_32 = arith.constant 0.000000e+00 : f32
    %46 = vector.broadcast %cst_32 : f32 to vector<8x1024xf32>
    %47 = arith.subf %46, %45 : vector<8x1024xf32>
    %48 = vector.broadcast %26 : vector<8x1xf32> to vector<8x1024xf32>
    %49 = arith.addf %38, %48 : vector<8x1024xf32>
    %50 = vector.broadcast %29 : vector<8x1xf32> to vector<8x1024xf32>
    %51 = vector.broadcast %6 : vector<1x1024xf32> to vector<8x1024xf32>
    %52 = arith.mulf %50, %51 : vector<8x1024xf32>
    %53 = arith.addf %49, %52 : vector<8x1024xf32>
    %54 = vector.broadcast %29 : vector<8x1xf32> to vector<8x1024xf32>
    %55 = vector.broadcast %9 : vector<1x1024xf32> to vector<8x1024xf32>
    %56 = arith.mulf %54, %55 : vector<8x1024xf32>
    %57 = arith.subf %47, %56 : vector<8x1024xf32>
    %58 = arith.mulf %38, %38 : vector<8x1024xf32>
    %59 = arith.mulf %47, %47 : vector<8x1024xf32>
    %60 = arith.addf %58, %59 : vector<8x1024xf32>
    %61 = tpu.reciprocal %60 {approx = true} : vector<8x1024xf32> -> vector<8x1024xf32>
    %62 = arith.mulf %60, %61 : vector<8x1024xf32>
    %cst_33 = arith.constant 2.000000e+00 : f32
    %63 = vector.broadcast %cst_33 : f32 to vector<8x1024xf32>
    %64 = arith.subf %63, %62 : vector<8x1024xf32>
    %65 = arith.mulf %61, %64 : vector<8x1024xf32>
    %66 = arith.mulf %53, %38 : vector<8x1024xf32>
    %67 = arith.mulf %57, %47 : vector<8x1024xf32>
    %68 = arith.addf %66, %67 : vector<8x1024xf32>
    %69 = arith.mulf %68, %65 : vector<8x1024xf32>
    %70 = arith.mulf %57, %38 : vector<8x1024xf32>
    %71 = arith.mulf %53, %47 : vector<8x1024xf32>
    %72 = arith.subf %70, %71 : vector<8x1024xf32>
    %73 = arith.mulf %72, %65 : vector<8x1024xf32>
    %c0_34 = arith.constant 0 : index
    %74 = arith.index_cast %c0_i32 : i32 to index
    %c0_35 = arith.constant 0 : index
    %c0_36 = arith.constant 0 : index
    %75 = vector.load %arg7[%c0_34, %74, %c0_35, %c0_36] : memref<1x2x8x1024xf32, #tpu.memory_space<vmem>>, vector<1x1x8x1024xf32>
    %76 = vector.shape_cast %75 : vector<1x1x8x1024xf32> to vector<8x1024xf32>
    %c0_37 = arith.constant 0 : index
    %77 = arith.index_cast %c0_i32 : i32 to index
    %c0_38 = arith.constant 0 : index
    %c0_39 = arith.constant 0 : index
    %78 = vector.load %arg8[%c0_37, %77, %c0_38, %c0_39] : memref<1x2x8x1024xf32, #tpu.memory_space<vmem>>, vector<1x1x8x1024xf32>
    %79 = vector.shape_cast %78 : vector<1x1x8x1024xf32> to vector<8x1024xf32>
    %c0_40 = arith.constant 0 : index
    %c0_41 = arith.constant 0 : index
    %c0_42 = arith.constant 0 : index
    %c0_43 = arith.constant 0 : index
    %80 = vector.load %arg11[%c0_40, %c0_41, %c0_42, %c0_43] : memref<1x1x8x1024xf32, #tpu.memory_space<vmem>>, vector<1x1x8x1024xf32>
    %81 = vector.shape_cast %80 : vector<1x1x8x1024xf32> to vector<8x1024xf32>
    %82 = arith.mulf %76, %69 : vector<8x1024xf32>
    %83 = arith.mulf %79, %73 : vector<8x1024xf32>
    %84 = arith.subf %82, %83 : vector<8x1024xf32>
    %85 = arith.addf %81, %84 : vector<8x1024xf32>
    %c0_44 = arith.constant 0 : index
    %c0_45 = arith.constant 0 : index
    %c0_46 = arith.constant 0 : index
    %c0_47 = arith.constant 0 : index
    %86 = vector.load %arg11[%c0_44, %c0_45, %c0_46, %c0_47] : memref<1x1x8x1024xf32, #tpu.memory_space<vmem>>, vector<1x1x8x1024xf32>
    %87 = vector.shape_cast %86 : vector<1x1x8x1024xf32> to vector<8x1024xf32>
    %88 = vector.shape_cast %85 : vector<8x1024xf32> to vector<1x1x8x1024xf32>
    tpu.vector_store %arg11[%c0_44, %c0_45, %c0_46, %c0_47], %88 {strides = array<i32>} : memref<1x1x8x1024xf32, #tpu.memory_space<vmem>>, vector<1x1x8x1024xf32>,
    %c0_48 = arith.constant 0 : index
    %c0_49 = arith.constant 0 : index
    %c0_50 = arith.constant 0 : index
    %c0_51 = arith.constant 0 : index
    %89 = vector.load %arg12[%c0_48, %c0_49, %c0_50, %c0_51] : memref<1x1x8x1024xf32, #tpu.memory_space<vmem>>, vector<1x1x8x1024xf32>
    %90 = vector.shape_cast %89 : vector<1x1x8x1024xf32> to vector<8x1024xf32>
    %91 = arith.mulf %76, %73 : vector<8x1024xf32>
    %92 = arith.mulf %79, %69 : vector<8x1024xf32>
    %93 = arith.addf %91, %92 : vector<8x1024xf32>
    %94 = arith.addf %90, %93 : vector<8x1024xf32>
    %c0_52 = arith.constant 0 : index
    %c0_53 = arith.constant 0 : index
    %c0_54 = arith.constant 0 : index
    %c0_55 = arith.constant 0 : index
    %95 = vector.load %arg12[%c0_52, %c0_53, %c0_54, %c0_55] : memref<1x1x8x1024xf32, #tpu.memory_space<vmem>>, vector<1x1x8x1024xf32>
    %96 = vector.shape_cast %95 : vector<1x1x8x1024xf32> to vector<8x1024xf32>
    %97 = vector.shape_cast %94 : vector<8x1024xf32> to vector<1x1x8x1024xf32>
    tpu.vector_store %arg12[%c0_52, %c0_53, %c0_54, %c0_55], %97 {strides = array<i32>} : memref<1x1x8x1024xf32, #tpu.memory_space<vmem>>, vector<1x1x8x1024xf32>,
    %c1_i32 = arith.constant 1 : i32
    %c0_56 = arith.constant 0 : index
    %c0_57 = arith.constant 0 : index
    %98 = arith.index_cast %c1_i32 : i32 to index
    %c0_58 = arith.constant 0 : index
    %c0_59 = arith.constant 0 : index
    %99 = vector.load %arg3[%c0_56, %c0_57, %98, %c0_58, %c0_59] : memref<1x1x2x8x1xf32, #tpu.memory_space<vmem>>, vector<1x1x1x8x1xf32>
    %100 = vector.shape_cast %99 : vector<1x1x1x8x1xf32> to vector<8x1xf32>
    %c0_60 = arith.constant 0 : index
    %c0_61 = arith.constant 0 : index
    %101 = arith.index_cast %c1_i32 : i32 to index
    %c0_62 = arith.constant 0 : index
    %c0_63 = arith.constant 0 : index
    %102 = vector.load %arg4[%c0_60, %c0_61, %101, %c0_62, %c0_63] : memref<1x1x2x8x1xf32, #tpu.memory_space<vmem>>, vector<1x1x1x8x1xf32>
    %103 = vector.shape_cast %102 : vector<1x1x1x8x1xf32> to vector<8x1xf32>
    %c0_64 = arith.constant 0 : index
    %c0_65 = arith.constant 0 : index
    %104 = arith.index_cast %c1_i32 : i32 to index
    %c0_66 = arith.constant 0 : index
    %c0_67 = arith.constant 0 : index
    %105 = vector.load %arg5[%c0_64, %c0_65, %104, %c0_66, %c0_67] : memref<1x1x2x8x1xf32, #tpu.memory_space<vmem>>, vector<1x1x1x8x1xf32>
    %106 = vector.shape_cast %105 : vector<1x1x1x8x1xf32> to vector<8x1xf32>
    %c0_68 = arith.constant 0 : index
    %c0_69 = arith.constant 0 : index
    %107 = arith.index_cast %c1_i32 : i32 to index
    %c0_70 = arith.constant 0 : index
    %c0_71 = arith.constant 0 : index
    %108 = vector.load %arg6[%c0_68, %c0_69, %107, %c0_70, %c0_71] : memref<1x1x2x8x1xf32, #tpu.memory_space<vmem>>, vector<1x1x1x8x1xf32>
    %109 = vector.shape_cast %108 : vector<1x1x1x8x1xf32> to vector<8x1xf32>
    %110 = vector.broadcast %100 : vector<8x1xf32> to vector<8x1024xf32>
    %111 = vector.broadcast %0 : vector<1x1024xf32> to vector<8x1024xf32>
    %112 = arith.mulf %110, %111 : vector<8x1024xf32>
    %cst_72 = arith.constant 1.000000e+00 : f32
    %113 = vector.broadcast %cst_72 : f32 to vector<8x1024xf32>
    %114 = arith.addf %113, %112 : vector<8x1024xf32>
    %115 = vector.broadcast %103 : vector<8x1xf32> to vector<8x1024xf32>
    %116 = vector.broadcast %6 : vector<1x1024xf32> to vector<8x1024xf32>
    %117 = arith.mulf %115, %116 : vector<8x1024xf32>
    %118 = arith.addf %114, %117 : vector<8x1024xf32>
    %119 = vector.broadcast %100 : vector<8x1xf32> to vector<8x1024xf32>
    %120 = vector.broadcast %1 : vector<1x1024xf32> to vector<8x1024xf32>
    %121 = arith.mulf %119, %120 : vector<8x1024xf32>
    %122 = vector.broadcast %103 : vector<8x1xf32> to vector<8x1024xf32>
    %123 = vector.broadcast %9 : vector<1x1024xf32> to vector<8x1024xf32>
    %124 = arith.mulf %122, %123 : vector<8x1024xf32>
    %125 = arith.addf %121, %124 : vector<8x1024xf32>
    %cst_73 = arith.constant 0.000000e+00 : f32
    %126 = vector.broadcast %cst_73 : f32 to vector<8x1024xf32>
    %127 = arith.subf %126, %125 : vector<8x1024xf32>
    %128 = vector.broadcast %106 : vector<8x1xf32> to vector<8x1024xf32>
    %129 = arith.addf %118, %128 : vector<8x1024xf32>
    %130 = vector.broadcast %109 : vector<8x1xf32> to vector<8x1024xf32>
    %131 = vector.broadcast %6 : vector<1x1024xf32> to vector<8x1024xf32>
    %132 = arith.mulf %130, %131 : vector<8x1024xf32>
    %133 = arith.addf %129, %132 : vector<8x1024xf32>
    %134 = vector.broadcast %109 : vector<8x1xf32> to vector<8x1024xf32>
    %135 = vector.broadcast %9 : vector<1x1024xf32> to vector<8x1024xf32>
    %136 = arith.mulf %134, %135 : vector<8x1024xf32>
    %137 = arith.subf %127, %136 : vector<8x1024xf32>
    %138 = arith.mulf %118, %118 : vector<8x1024xf32>
    %139 = arith.mulf %127, %127 : vector<8x1024xf32>
    %140 = arith.addf %138, %139 : vector<8x1024xf32>
    %141 = tpu.reciprocal %140 {approx = true} : vector<8x1024xf32> -> vector<8x1024xf32>
    %142 = arith.mulf %140, %141 : vector<8x1024xf32>
    %cst_74 = arith.constant 2.000000e+00 : f32
    %143 = vector.broadcast %cst_74 : f32 to vector<8x1024xf32>
    %144 = arith.subf %143, %142 : vector<8x1024xf32>
    %145 = arith.mulf %141, %144 : vector<8x1024xf32>
    %146 = arith.mulf %133, %118 : vector<8x1024xf32>
    %147 = arith.mulf %137, %127 : vector<8x1024xf32>
    %148 = arith.addf %146, %147 : vector<8x1024xf32>
    %149 = arith.mulf %148, %145 : vector<8x1024xf32>
    %150 = arith.mulf %137, %118 : vector<8x1024xf32>
    %151 = arith.mulf %133, %127 : vector<8x1024xf32>
    %152 = arith.subf %150, %151 : vector<8x1024xf32>
    %153 = arith.mulf %152, %145 : vector<8x1024xf32>
    %c0_75 = arith.constant 0 : index
    %154 = arith.index_cast %c1_i32 : i32 to index
    %c0_76 = arith.constant 0 : index
    %c0_77 = arith.constant 0 : index
    %155 = vector.load %arg7[%c0_75, %154, %c0_76, %c0_77] : memref<1x2x8x1024xf32, #tpu.memory_space<vmem>>, vector<1x1x8x1024xf32>
    %156 = vector.shape_cast %155 : vector<1x1x8x1024xf32> to vector<8x1024xf32>
    %c0_78 = arith.constant 0 : index
    %157 = arith.index_cast %c1_i32 : i32 to index
    %c0_79 = arith.constant 0 : index
    %c0_80 = arith.constant 0 : index
    %158 = vector.load %arg8[%c0_78, %157, %c0_79, %c0_80] : memref<1x2x8x1024xf32, #tpu.memory_space<vmem>>, vector<1x1x8x1024xf32>
    %159 = vector.shape_cast %158 : vector<1x1x8x1024xf32> to vector<8x1024xf32>
    %c0_81 = arith.constant 0 : index
    %c0_82 = arith.constant 0 : index
    %c0_83 = arith.constant 0 : index
    %c0_84 = arith.constant 0 : index
    %160 = vector.load %arg11[%c0_81, %c0_82, %c0_83, %c0_84] : memref<1x1x8x1024xf32, #tpu.memory_space<vmem>>, vector<1x1x8x1024xf32>
    %161 = vector.shape_cast %160 : vector<1x1x8x1024xf32> to vector<8x1024xf32>
    %162 = arith.mulf %156, %149 : vector<8x1024xf32>
    %163 = arith.mulf %159, %153 : vector<8x1024xf32>
    %164 = arith.subf %162, %163 : vector<8x1024xf32>
    %165 = arith.addf %161, %164 : vector<8x1024xf32>
    %c0_85 = arith.constant 0 : index
    %c0_86 = arith.constant 0 : index
    %c0_87 = arith.constant 0 : index
    %c0_88 = arith.constant 0 : index
    %166 = vector.load %arg11[%c0_85, %c0_86, %c0_87, %c0_88] : memref<1x1x8x1024xf32, #tpu.memory_space<vmem>>, vector<1x1x8x1024xf32>
    %167 = vector.shape_cast %166 : vector<1x1x8x1024xf32> to vector<8x1024xf32>
    %168 = vector.shape_cast %165 : vector<8x1024xf32> to vector<1x1x8x1024xf32>
    tpu.vector_store %arg11[%c0_85, %c0_86, %c0_87, %c0_88], %168 {strides = array<i32>} : memref<1x1x8x1024xf32, #tpu.memory_space<vmem>>, vector<1x1x8x1024xf32>,
    %c0_89 = arith.constant 0 : index
    %c0_90 = arith.constant 0 : index
    %c0_91 = arith.constant 0 : index
    %c0_92 = arith.constant 0 : index
    %169 = vector.load %arg12[%c0_89, %c0_90, %c0_91, %c0_92] : memref<1x1x8x1024xf32, #tpu.memory_space<vmem>>, vector<1x1x8x1024xf32>
    %170 = vector.shape_cast %169 : vector<1x1x8x1024xf32> to vector<8x1024xf32>
    %171 = arith.mulf %156, %153 : vector<8x1024xf32>
    %172 = arith.mulf %159, %149 : vector<8x1024xf32>
    %173 = arith.addf %171, %172 : vector<8x1024xf32>
    %174 = arith.addf %170, %173 : vector<8x1024xf32>
    %c0_93 = arith.constant 0 : index
    %c0_94 = arith.constant 0 : index
    %c0_95 = arith.constant 0 : index
    %c0_96 = arith.constant 0 : index
    %175 = vector.load %arg12[%c0_93, %c0_94, %c0_95, %c0_96] : memref<1x1x8x1024xf32, #tpu.memory_space<vmem>>, vector<1x1x8x1024xf32>
    %176 = vector.shape_cast %175 : vector<1x1x8x1024xf32> to vector<8x1024xf32>
    %177 = vector.shape_cast %174 : vector<8x1024xf32> to vector<1x1x8x1024xf32>
    tpu.vector_store %arg12[%c0_93, %c0_94, %c0_95, %c0_96], %177 {strides = array<i32>} : memref<1x1x8x1024xf32, #tpu.memory_space<vmem>>, vector<1x1x8x1024xf32>,
    %c2_i32 = arith.constant 2 : i32
    return
  }
  func.func @transform_0(%arg0: i32, %arg1: i32, %arg2: i32) -> (i32, i32, i32, i32, i32) {
    %c0_i32 = arith.constant 0 : i32
    %c0_i32_0 = arith.constant 0 : i32
    %c0_i32_1 = arith.constant 0 : i32
    return %arg0, %arg2, %c0_i32, %arg1, %c0_i32_0 : i32, i32, i32, i32, i32
  }
  func.func @transform_1(%arg0: i32, %arg1: i32, %arg2: i32) -> (i32, i32, i32, i32, i32) {
    %c0_i32 = arith.constant 0 : i32
    %c0_i32_0 = arith.constant 0 : i32
    %c0_i32_1 = arith.constant 0 : i32
    return %arg0, %arg2, %c0_i32, %arg1, %c0_i32_0 : i32, i32, i32, i32, i32
  }
  func.func @transform_2(%arg0: i32, %arg1: i32, %arg2: i32) -> (i32, i32, i32, i32, i32) {
    %c0_i32 = arith.constant 0 : i32
    %c0_i32_0 = arith.constant 0 : i32
    %c0_i32_1 = arith.constant 0 : i32
    return %arg0, %arg2, %c0_i32, %arg1, %c0_i32_0 : i32, i32, i32, i32, i32
  }
  func.func @transform_3(%arg0: i32, %arg1: i32, %arg2: i32) -> (i32, i32, i32, i32, i32) {
    %c0_i32 = arith.constant 0 : i32
    %c0_i32_0 = arith.constant 0 : i32
    %c0_i32_1 = arith.constant 0 : i32
    return %arg0, %arg2, %c0_i32, %arg1, %c0_i32_0 : i32, i32, i32, i32, i32
  }
  func.func @transform_4(%arg0: i32, %arg1: i32, %arg2: i32) -> (i32, i32, i32, i32) {
    %c0_i32 = arith.constant 0 : i32
    %c0_i32_0 = arith.constant 0 : i32
    %c0_i32_1 = arith.constant 0 : i32
    return %arg0, %c0_i32, %arg1, %c0_i32_0 : i32, i32, i32, i32
  }
  func.func @transform_5(%arg0: i32, %arg1: i32, %arg2: i32) -> (i32, i32, i32, i32) {
    %c0_i32 = arith.constant 0 : i32
    %c0_i32_0 = arith.constant 0 : i32
    %c0_i32_1 = arith.constant 0 : i32
    return %arg0, %c0_i32, %arg1, %c0_i32_0 : i32, i32, i32, i32
  }
  func.func @transform_6(%arg0: i32, %arg1: i32, %arg2: i32) -> (i32, i32) {
    %c0_i32 = arith.constant 0 : i32
    %c0_i32_0 = arith.constant 0 : i32
    %c0_i32_1 = arith.constant 0 : i32
    return %c0_i32, %c0_i32_0 : i32, i32
  }
  func.func @transform_7(%arg0: i32, %arg1: i32, %arg2: i32) -> (i32, i32) {
    %c0_i32 = arith.constant 0 : i32
    %c0_i32_0 = arith.constant 0 : i32
    %c0_i32_1 = arith.constant 0 : i32
    return %c0_i32, %c0_i32_0 : i32, i32
  }
  func.func @transform_8(%arg0: i32, %arg1: i32, %arg2: i32) -> (i32, i32, i32, i32) {
    %c0_i32 = arith.constant 0 : i32
    %c0_i32_0 = arith.constant 0 : i32
    return %arg0, %arg2, %arg1, %c0_i32 : i32, i32, i32, i32
  }
  func.func @transform_9(%arg0: i32, %arg1: i32, %arg2: i32) -> (i32, i32, i32, i32) {
    %c0_i32 = arith.constant 0 : i32
    %c0_i32_0 = arith.constant 0 : i32
    return %arg0, %arg2, %arg1, %c0_i32 : i32, i32, i32, i32
  }
}

</mosaic_0001>

<bundles_post_ra>
// kernel: reverse.3
= control target key start
LH: loop header
LB: loop body
LE: loop exit
PB: predicated region body
PF: predicated region fallthrough
CT: control target
= control target key end

     0   :  { %v2_v0 = vlaneseq  ;;  %s392_s0 = inlined_call_operand.vmem [shape: f32[6,5,1024], index: 0, kind: input, shape index: {}]   ;;  %s393_s1 = inlined_call_operand.vmem [shape: f32[6,5,1024], index: 1, kind: output, shape index: {}]  }
   0x2   :  { %v348_v1 = vsub.s32 127, %v2_v0 }
   0x4   :  { %4 = vset.pattern.permute.xlu0 %v348_v1 }
   0x5   :  { %s351_s6 = smov 0   ;;  %s353_s7 = smov 0  }
   0x6   :  { %s355_s8 = smov 0  }
   0x7 LB: > { %s271_s9 = sadd.s32 4294967295, %s336_s8   ;;  %s22_s10 = sadd.s32 1, %s332_s7  ;;  %s336_s8 = sphi %s355_s8, %s10_s8   ;;  %s332_s7 = sphi %s353_s7, %s395_s7   ;;  %s328_s6 = sphi %s351_s6, %s394_s6  }
   0x8   : > { %p23_p0 = scmp.ge.s32.totalorder %s22_s10, 8  ;;  %p273_p1 = scmp.ge.s32.totalorder %s336_s8, 8 }
   0x9   : > { %s45_s11 = sand.u32 (!%p273_p1), 1, %s336_s8   ;;  %s48_s12 = ssub.s32 (!%p273_p1), 7, %s332_s7 }
   0xa   : > { %s397_s10 = smov (%p23_p0, %s22_s10), 0  ;;  %43 = sbr.rel (%p273_p1) target bundleno = 19 (0x13), region = 16 }
   0xb   : > { %s287_s13 = smul.u32 (!%p273_p1), 40, %s45_s11  ;;  %s274_s14 = sshll.u32 (!%p273_p1), %s48_s12, 3 }
   0xc   : > { %s55_s17 = scalar_lea.vmem (!%p273_p1), %s392_s0, %s274_s14 }
   0xd   : > { %v91_v2 = vld [vmem:[%s55_s17] sm:$0xff] (!%p273_p1)  ;;  %s47_s18 = scalar_lea.vmem (!%p273_p1), [#allocation0], %s287_s13 }
   0xe   : > { %v93_v3 = vld [vmem:[%s55_s17 + $0x40] sm:$0xff] (!%p273_p1)  ;;  %92 = vst [vmem:[%s47_s18] sm:$0xff] (!%p273_p1), %v91_v2 }
   0xf   : > { %v95_v4 = vld [vmem:[%s55_s17 + $0x80] sm:$0xff] (!%p273_p1)  ;;  %94 = vst [vmem:[%s47_s18 + $0x8] sm:$0xff] (!%p273_p1), %v93_v3 }
  0x10   : > { %96 = vst [vmem:[%s47_s18 + $0x10] sm:$0xff] (!%p273_p1), %v95_v4  ;;  %v97_v5 = vld [vmem:[%s55_s17 + $0xc0] sm:$0xff] (!%p273_p1) }
  0x11   : > { %v99_v6 = vld [vmem:[%s55_s17 + $0x100] sm:$0xff]  ;;  %98 = vst [vmem:[%s47_s18 + $0x18] sm:$0xff] %v97_v5 }
  0x12   : > { %100 = vst [vmem:[%s47_s18 + $0x20] sm:$0xff] %v99_v6 }
  0x13 PF: > { %p275_p2 = scmp.ge.s32.totalorder %s336_s8, 1  ;;  %p105_p3 = scmp.lt.s32.totalorder %s336_s8, 9 }
  0x15   : > { %p106_p4 = pnand %p275_p2, %p105_p3 }
  0x16   : > { %313 = vset.pattern.permute.xlu1 (!%p106_p4), %v348_v1  ;;  %s112_s19 = sand.u32 (!%p106_p4), 1, %s271_s9   ;;  %s284_s22 = sshll.u32 (!%p106_p4), %s328_s6, 3 }
  0x17   : > { %109 = sbr.rel (%p106_p4) target bundleno = 165 (0xa5), region = 54  ;;  %s164_s25 = scalar_lea.vmem (!%p106_p4), %s393_s1, %s284_s22 }
  0x18   : > { %s288_s20 = smul.u32 (!%p106_p4), 40, %s112_s19 }
  0x1a   : > { %s114_s21 = scalar_lea.vmem (!%p106_p4), [#allocation0], %s288_s20 }
  0x1b   : > { %v278_v7 = vld [vmem:[%s114_s21 + $0x10] sm:$0xff] (!%p106_p4)  ;;  %v126_v8 = vld [vmem:[%s114_s21] sm:$0xff] (!%p106_p4)  ;;  %v280_v9 = vld [vmem:[%s114_s21 + $0x18] sm:$0xff] (!%p106_p4) }
  0x1c   : > { %139 = vperm.xlu1 (!%p106_p4), %313, %v278_v7   ;;  %127 = vperm.xlu0 (!%p106_p4), %4, %v126_v8   ;;  %v276_v10 = vld [vmem:[%s114_s21 + $0x8] sm:$0xff] (!%p106_p4)  ;;  %v282_v11 = vld [vmem:[%s114_s21 + $0x20] sm:$0xff] (!%p106_p4) }
  0x20   : > { %145 = vperm.xlu1 %313, %v280_v9   ;;  %133 = vperm.xlu0 %4, %v276_v10  }
  0x24   : > { %151 = vperm.xlu0 %4, %v282_v11  }
  0x9b   : > { %v140_v12 = vpop.permute.xlu1 %139  ;;  %v128_v13 = vpop.permute.xlu0 %127 }
  0x9c   : > { %205 = vst [vmem:[%s164_s25 + $0x80] sm:$0xff] %v140_v12  ;;  %201 = vst [vmem:[%s164_s25] sm:$0xff] %v128_v13 }
  0x9f   : > { %v146_v14 = vpop.permute.xlu1 %145  ;;  %v134_v15 = vpop.permute.xlu0 %133 }
  0xa0   : > { %207 = vst [vmem:[%s164_s25 + $0xc0] sm:$0xff] %v146_v14  ;;  %203 = vst [vmem:[%s164_s25 + $0x40] sm:$0xff] %v134_v15 }
  0xa3   : > { %v152_v16 = vpop.permute.xlu0 %151 }
  0xa4   : > { %209 = vst [vmem:[%s164_s25 + $0x100] sm:$0xff] %v152_v16 }
  0xa5 PF: > { %s10_s8 = sadd.s32 1, %s336_s8   ;;  %s394_s6 = smov %s332_s7 }
  0xa6   : > { %p7_p5 = scmp.ge.s32.totalorder %s10_s8, 10   ;;  %s395_s7 = smov %s397_s10 }
  0xa8   :  { %9 = sbr.rel (!%p7_p5) target bundleno = 7 (0x7), region = 126 }

// kernel: biquad_forward.1
= control target key start
LH: loop header
LB: loop body
LE: loop exit
PB: predicated region body
PF: predicated region fallthrough
CT: control target
= control target key end

     0   :  { %s2061_s30 = smov 0   ;;  %s2063_s10 = smov 0   ;;  %s2978_s0 = inlined_call_operand.vmem [shape: f32[2,3,2,8,1], index: 0, kind: input, shape index: {}]   ;;  %s2979_s1 = inlined_call_operand.vmem [shape: f32[2,3,2,8,1], index: 1, kind: input, shape index: {}]   ;;  %s2980_s2 = inlined_call_operand.vmem [shape: f32[2,3,2,8,1], index: 2, kind: input, shape index: {}]   ;;  %s2981_s3 = inlined_call_operand.vmem [shape: f32[2,3,2,8,1], index: 3, kind: input, shape index: {}]   ;;  %s2982_s4 = inlined_call_operand.vmem [shape: f32[2,2,8,1024], index: 4, kind: input, shape index: {}]   ;;  %s2983_s5 = inlined_call_operand.vmem [shape: f32[2,2,8,1024], index: 5, kind: input, shape index: {}]   ;;  %s2984_s6 = inlined_call_operand.vmem [shape: f32[1,1024], index: 6, kind: input, shape index: {}]   ;;  %s2985_s7 = inlined_call_operand.vmem [shape: f32[1,1024], index: 7, kind: input, shape index: {}]   ;;  %s2986_s8 = inlined_call_operand.vmem [shape: f32[2,3,8,1024], index: 8, kind: output, shape index: {0}]   ;;  %s2987_s9 = inlined_call_operand.vmem [shape: f32[2,3,8,1024], index: 9, kind: output, shape index: {1}]  }
   0x1   :  { %s2065_s11 = smov 0   ;;  %s2067_s12 = smov 0  }
   0x2   :  { %s2069_s13 = smov 0  }
   0x3 LB: > { %s32_s14 = sadd.s32 1, %s2000_s11  ;;  %s39_s15 = sadd.s32 1, %s2004_s12  ;;  %s2008_s13 = sphi %s2069_s13, %s20_s13   ;;  %s2004_s12 = sphi %s2067_s12, %s3195_s12   ;;  %s2000_s11 = sphi %s2065_s11, %s3194_s11   ;;  %s1996_s10 = sphi %s2063_s10, %s3193_s10   ;;  %s1992_s30 = sphi %s2061_s30, %s3192_s30  }
   0x4   : > { %p33_p0 = scmp.ge.s32.totalorder %s32_s14, 3  ;;  %p1850_p1 = scmp.ge.s32.totalorder %s2008_s13, 1 }
   0x5   : > { %p423_p2 = scmp.lt.s32.totalorder %s2008_s13, 7 }
   0x6   : > { %s3197_s14 = smov (%p33_p0, %s32_s14), 0  ;;  %s3199_s15 = smov (!%p33_p0, %s39_s15), %s2004_s12 }
   0x7   : > { %p424_p3 = pnand %p1850_p1, %p423_p2  ;;  %p41_p4 = scmp.ge.s32.totalorder %s3199_s15, 2 }
   0x9   : > { %s3201_s15 = smov (%p41_p4, %s3199_s15), 0  ;;  %427 = sbr.rel (%p424_p3) target bundleno = 300 (0x12c), region = 52 }
  0x10   : > { %p541_p5 = scmp.lt.s32.totalorder %s1996_s10, 1  ;;  %p543_p6 = scmp.lt.s32.totalorder %s1992_s30, 2  ;;  %v2010_v0 = vmov 0   ;;  %v666_v9 = vlaneseq  ;;  %v633_v10 = vld [vmem:[%s2984_s6] sm:$0xff] }
  0x11   : > { %1937 = vset.pattern.permute.xlu1 %v2010_v0  ;;  %1936 = vset.pattern.permute.xlu0 %v2010_v0  ;;  %v635_v11 = vmul.f32 2.0, %v633_v10  ;;  %v634_v13 = vld [vmem:[%s2985_s7] sm:$0xff] }
  0x12   : > { %s3203_s10 = smov (!%p541_p5, %s1996_s10), 1  ;;  %s3205_s30 = smov (!%p543_p6, %s1992_s30), 2  ;;  %v667_v12 = vshrl.u32 %v666_v9, 7  ;;  %v638_v21 = vmul.f32 2.0, %v634_v13 }
  0x13   : > { %s1892_s16 = smul.u32 6, %s3203_s10  ;;  %s1851_s17 = sshll.u32 %s3205_s30, 1  ;;  %v636_v14 = vmul.f32 %v635_v11, %v633_v10 }
  0x14   : > { %s1863_s20 = sshll.u32 %s3205_s30, 3  ;;  %s1893_s24 = smul.u32 24, %s3203_s10  ;;  %v668_v15 = vsub.s32 0, %v667_v12  ;;  %v672_v16 = vsub.s32 1, %v667_v12  ;;  %v676_v17 = vsub.s32 2, %v667_v12  ;;  %v680_v18 = vsub.s32 3, %v667_v12 }
  0x15   : > { %s550_s18 = sadd.s32 %s1892_s16, %s1851_s17  ;;  %v684_v19 = vsub.s32 4, %v667_v12  ;;  %v688_v20 = vsub.s32 5, %v667_v12  ;;  %v692_v22 = vsub.s32 6, %v667_v12  ;;  %v696_v23 = vsub.s32 7, %v667_v12 }
  0x16   : > { %s1852_s19 = sshll.u32 %s550_s18, 3  ;;  %s2101_s28 = sadd.s32 %s1893_s24, %s1863_s20  ;;  %v1867_v24 = vadd.f32 -1.0, %v636_v14  ;;  %v2115_v25 = vrot.slane %v633_v10, %v668_v15  ;;  %v2117_v26 = vrot.slane %v633_v10, %v672_v16  ;;  %v2119_v27 = vrot.slane %v633_v10, %v676_v17 }
  0x17   : > { %s552_s23 = scalar_lea.vmem %s2978_s0, %s1852_s19  ;;  %s564_s27 = scalar_lea.vmem %s2979_s1, %s1852_s19  ;;  %v2121_v28 = vrot.slane %v633_v10, %v680_v18  ;;  %v2123_v29 = vrot.slane %v633_v10, %v684_v19  ;;  %v2125_v30 = vrot.slane %v633_v10, %v688_v20  ;;  %v639_v31 = vmul.f32 %v638_v21, %v633_v10 }
  0x18   : > { %v1868_v1 = vld [vmem:[%s552_s23 + $0x8] sm:$0xff]  ;;  %v656_v2 = vld [vmem:[%s552_s23] sm:$0xff]  ;;  %s588_s30 = scalar_lea.vmem %s2981_s3, %s1852_s19  ;;  %s576_s21 = scalar_lea.vmem %s2980_s2, %s1852_s19  ;;  %3054 = vst [vmem:[#allocation2_spill] sm:$0xff] %v2115_v25  ;;  %3055 = vst [vmem:[#allocation3_spill] sm:$0xff] %v2117_v26  ;;  %v2127_v32 = vrot.slane %v634_v13, %v668_v15  ;;  %v2129_v33 = vrot.slane %v634_v13, %v672_v16  ;;  %v2131_v34 = vrot.slane %v634_v13, %v676_v17 }
  0x19   : > { %1190 = vperm.xlu1 %1937, %v1868_v1   ;;  %662 = vperm.xlu0 %1936, %v656_v2   ;;  %v1869_v3 = vld [vmem:[%s564_s27 + $0x8] sm:$0xff]  ;;  %v657_v4 = vld [vmem:[%s564_s27] sm:$0xff]  ;;  %3056 = vst [vmem:[#allocation4_spill] sm:$0xff] %v2119_v27  ;;  %3057 = vst [vmem:[#allocation5_spill] sm:$0xff] %v2121_v28  ;;  %v2133_v35 = vrot.slane %v633_v10, %v692_v22  ;;  %v2135_v36 = vrot.slane %v633_v10, %v696_v23  ;;  %s1890_s19 = sshll.u32 %s3203_s10, 7 }
  0x1a   : > { %v659_v5 = vld [vmem:[%s588_s30] sm:$0xff]  ;;  %v1871_v7 = vld [vmem:[%s588_s30 + $0x8] sm:$0xff]  ;;  %3058 = vst [vmem:[#allocation6_spill] sm:$0xff] %v2123_v29  ;;  %3059 = vst [vmem:[#allocation7_spill] sm:$0xff] %v2125_v30  ;;  %v2137_v37 = vrot.slane %v634_v13, %v680_v18  ;;  %v2139_v38 = vrot.slane %v634_v13, %v684_v19  ;;  %v2141_v39 = vrot.slane %v1867_v24, %v668_v15  ;;  %s2425_s26 = scalar_lea.vmem %s2982_s4, %s1890_s19  ;;  %s2443_s16 = scalar_lea.vmem %s2983_s5, %s1890_s19 }
  0x1b   : > { %v658_v6 = vld [vmem:[%s576_s21] sm:$0xff]  ;;  %v1870_v8 = vld [vmem:[%s576_s21 + $0x8] sm:$0xff]  ;;  %3060 = vst [vmem:[#allocation8_spill] sm:$0xff] %v2127_v32  ;;  %3061 = vst [vmem:[#allocation9_spill] sm:$0xff] %v2129_v33  ;;  %v2143_v40 = vrot.slane %v1867_v24, %v672_v16  ;;  %v2145_v41 = vrot.slane %v1867_v24, %v676_v17  ;;  %v2147_v42 = vrot.slane %v634_v13, %v688_v20  ;;  %s1864_s30 = sshll.u32 %s2101_s28, 3 }
  0x1c   : > { %3062 = vst [vmem:[#allocation10_spill] sm:$0xff] %v2131_v34  ;;  %3063 = vst [vmem:[#allocation11_spill] sm:$0xff] %v2133_v35  ;;  %v2149_v43 = vrot.slane %v1867_v24, %v680_v18  ;;  %v2151_v44 = vrot.slane %v1867_v24, %v684_v19  ;;  %v2153_v45 = vrot.slane %v1867_v24, %v688_v20  ;;  %s619_s21 = scalar_lea.vmem %s2986_s8, %s1864_s30  ;;  %s632_s23 = scalar_lea.vmem %s2987_s9, %s1864_s30 }
  0x1d   : > { %1211 = vperm.xlu1 %1937, %v1869_v3   ;;  %724 = vperm.xlu0 %1936, %v657_v4   ;;  %3064 = vst [vmem:[#allocation12_spill] sm:$0xff] %v2135_v36  ;;  %3065 = vst [vmem:[#allocation13_spill] sm:$0xff] %v2137_v37  ;;  %v2155_v46 = vrot.slane %v1867_v24, %v692_v22  ;;  %v2157_v47 = vrot.slane %v1867_v24, %v696_v23 }
  0x1e   : > { %3066 = vst [vmem:[#allocation14_spill] sm:$0xff] %v2139_v38  ;;  %3067 = vst [vmem:[#allocation15_spill] sm:$0xff] %v2141_v39  ;;  %v2159_v48 = vrot.slane %v634_v13, %v692_v22  ;;  %v2161_v49 = vrot.slane %v634_v13, %v696_v23  ;;  %v2163_v50 = vrot.slane %v639_v31, %v668_v15 }
  0x1f   : > { %3068 = vst [vmem:[#allocation16_spill] sm:$0xff] %v2143_v40  ;;  %3069 = vst [vmem:[#allocation17_spill] sm:$0xff] %v2145_v41  ;;  %v2165_v51 = vrot.slane %v639_v31, %v672_v16  ;;  %v2167_v52 = vrot.slane %v639_v31, %v676_v17  ;;  %v2169_v53 = vrot.slane %v639_v31, %v680_v18 }
  0x20   : > { %3070 = vst [vmem:[#allocation18_spill] sm:$0xff] %v2147_v42  ;;  %3071 = vst [vmem:[#allocation19_spill] sm:$0xff] %v2149_v43  ;;  %v2171_v55 = vrot.slane %v639_v31, %v684_v19  ;;  %v2173_v56 = vrot.slane %v639_v31, %v688_v20  ;;  %v2175_v57 = vrot.slane %v639_v31, %v692_v22 }
  0x21   : > { %913 = vperm.xlu1 %1937, %v659_v5   ;;  %900 = vperm.xlu0 %1936, %v658_v6   ;;  %3072 = vst [vmem:[#allocation20_spill] sm:$0xff] %v2151_v44  ;;  %3073 = vst [vmem:[#allocation21_spill] sm:$0xff] %v2153_v45  ;;  %v2177_v58 = vrot.slane %v639_v31, %v696_v23 }
  0x22   : > { %3074 = vst [vmem:[#allocation22_spill] sm:$0xff] %v2155_v46  ;;  %3075 = vst [vmem:[#allocation23_spill] sm:$0xff] %v2157_v47 }
  0x23   : > { %3076 = vst [vmem:[#allocation24_spill] sm:$0xff] %v2159_v48  ;;  %3077 = vst [vmem:[#allocation25_spill] sm:$0xff] %v2161_v49 }
  0x24   : > { %3078 = vst [vmem:[#allocation26_spill] sm:$0xff] %v2163_v50  ;;  %3079 = vst [vmem:[#allocation27_spill] sm:$0xff] %v2165_v51 }
  0x25   : > { %1277 = vperm.xlu1 %1937, %v1871_v7   ;;  %1264 = vperm.xlu0 %1936, %v1870_v8   ;;  %3080 = vst [vmem:[#allocation28_spill] sm:$0xff] %v2167_v52  ;;  %3081 = vst [vmem:[#allocation29_spill] sm:$0xff] %v2169_v53 }
  0x26   : > { %3082 = vst [vmem:[#allocation30_spill] sm:$0xff] %v2171_v55  ;;  %3083 = vst [vmem:[#allocation31_spill] sm:$0xff] %v2173_v56 }
  0x27   : > { %3084 = vst [vmem:[#allocation32_spill] sm:$0xff] %v2175_v57  ;;  %3085 = vst [vmem:[#allocation33_spill] sm:$0xff] %v2177_v58 }
  0x98   : > { %v663_v54 = vpop.permute.xlu0 %662  ;;  %v2183_v63 = vpop.permute.xlu1 %1190 }
  0x99   : > { %v706_v59 = vmul.f32 %v2115_v25, %v663_v54  ;;  %v707_v60 = vmul.f32 %v2117_v26, %v663_v54  ;;  %v708_v61 = vmul.f32 %v2119_v27, %v663_v54  ;;  %v709_v62 = vmul.f32 %v2121_v28, %v663_v54  ;;  %3086 = vst [vmem:[#allocation34_spill] sm:$0xff] %v2183_v63 }
  0x9a   : > { %v710_v0 = vmul.f32 %v2123_v29, %v663_v54  ;;  %v711_v1 = vmul.f32 %v2125_v30, %v663_v54  ;;  %v712_v2 = vmul.f32 %v2133_v35, %v663_v54  ;;  %v713_v3 = vmul.f32 %v2135_v36, %v663_v54 }
  0x9b   : > { %v714_v4 = vadd.f32 1.0, %v706_v59  ;;  %v715_v5 = vadd.f32 1.0, %v707_v60  ;;  %v716_v6 = vadd.f32 1.0, %v708_v61  ;;  %v717_v7 = vadd.f32 1.0, %v709_v62 }
  0x9c   : > { %v725_v8 = vpop.permute.xlu0 %724  ;;  %v718_v9 = vadd.f32 1.0, %v710_v0  ;;  %v719_v10 = vadd.f32 1.0, %v711_v1  ;;  %v720_v11 = vadd.f32 1.0, %v712_v2  ;;  %v721_v12 = vadd.f32 1.0, %v713_v3  ;;  %v2205_v31 = vpop.permute.xlu1 %1211 }
  0x9d   : > { %v768_v13 = vmul.f32 %v2141_v39, %v725_v8  ;;  %v769_v14 = vmul.f32 %v2143_v40, %v725_v8  ;;  %v770_v15 = vmul.f32 %v2145_v41, %v725_v8  ;;  %v771_v16 = vmul.f32 %v2149_v43, %v725_v8  ;;  %3087 = vst [vmem:[#allocation35_spill] sm:$0xff] %v2205_v31 }
  0x9e   : > { %v772_v17 = vmul.f32 %v2151_v44, %v725_v8  ;;  %v773_v18 = vmul.f32 %v2153_v45, %v725_v8  ;;  %v774_v19 = vmul.f32 %v2155_v46, %v725_v8  ;;  %v775_v20 = vmul.f32 %v2157_v47, %v725_v8 }
  0x9f   : > { %v2197_v21 = vadd.f32 %v768_v13, %v714_v4  ;;  %v2199_v22 = vadd.f32 %v769_v14, %v715_v5  ;;  %v2201_v23 = vadd.f32 %v770_v15, %v716_v6  ;;  %v2203_v24 = vadd.f32 %v771_v16, %v717_v7 }
  0xa0   : > { %v2207_v59 = vadd.f32 %v772_v17, %v718_v9  ;;  %v2209_v60 = vadd.f32 %v773_v18, %v719_v10  ;;  %v2211_v61 = vadd.f32 %v774_v19, %v720_v11  ;;  %v2213_v62 = vadd.f32 %v775_v20, %v721_v12  ;;  %v914_v20 = vpop.permute.xlu1 %913 }
  0xa1   : > { %v825_v0 = vmul.f32 %v2127_v32, %v663_v54  ;;  %v826_v1 = vmul.f32 %v2129_v33, %v663_v54  ;;  %v827_v2 = vmul.f32 %v2131_v34, %v663_v54  ;;  %v828_v3 = vmul.f32 %v2137_v37, %v663_v54 }
  0xa2   : > { %v829_v4 = vmul.f32 %v2139_v38, %v663_v54  ;;  %v830_v5 = vmul.f32 %v2147_v42, %v663_v54  ;;  %v831_v6 = vmul.f32 %v2159_v48, %v663_v54  ;;  %v832_v7 = vmul.f32 %v2161_v49, %v663_v54 }
  0xa3   : > { %v874_v9 = vmul.f32 %v2163_v50, %v725_v8  ;;  %v875_v10 = vmul.f32 %v2165_v51, %v725_v8  ;;  %v876_v11 = vmul.f32 %v2167_v52, %v725_v8  ;;  %v877_v12 = vmul.f32 %v2169_v53, %v725_v8 }
  0xa4   : > { %v878_v13 = vmul.f32 %v2171_v55, %v725_v8  ;;  %v879_v14 = vmul.f32 %v2173_v56, %v725_v8  ;;  %v880_v15 = vmul.f32 %v2175_v57, %v725_v8  ;;  %v881_v16 = vmul.f32 %v2177_v58, %v725_v8 }
  0xa5   : > { %v882_v17 = vadd.f32 %v874_v9, %v825_v0  ;;  %v883_v18 = vadd.f32 %v875_v10, %v826_v1  ;;  %v884_v19 = vadd.f32 %v876_v11, %v827_v2  ;;  %v885_v54 = vadd.f32 %v877_v12, %v828_v3 }
  0xa6   : > { %v886_v49 = vadd.f32 %v878_v13, %v829_v4  ;;  %v887_v48 = vadd.f32 %v879_v14, %v830_v5  ;;  %v888_v42 = vadd.f32 %v880_v15, %v831_v6  ;;  %v889_v38 = vadd.f32 %v881_v16, %v832_v7 }
  0xa7   : > { %v2231_v37 = vsub.f32 0.0, %v882_v17  ;;  %v2233_v34 = vsub.f32 0.0, %v883_v18  ;;  %v2235_v33 = vsub.f32 0.0, %v884_v19  ;;  %v2237_v32 = vsub.f32 0.0, %v885_v54 }
  0xa8   : > { %v2239_v31 = vsub.f32 0.0, %v886_v49  ;;  %v2241_v8 = vsub.f32 0.0, %v887_v48  ;;  %v2243_v0 = vsub.f32 0.0, %v888_v42  ;;  %v2245_v1 = vsub.f32 0.0, %v889_v38 }
  0xa9   : > { %v2248_v2 = vmul.f32 %v914_v20, %v2141_v39  ;;  %v2251_v3 = vmul.f32 %v914_v20, %v2143_v40  ;;  %v2254_v4 = vmul.f32 %v914_v20, %v2145_v41  ;;  %v2257_v5 = vmul.f32 %v914_v20, %v2149_v43 }
  0xaa   : > { %v2260_v49 = vmul.f32 %v914_v20, %v2151_v44  ;;  %v2263_v42 = vmul.f32 %v914_v20, %v2153_v45  ;;  %v2266_v38 = vmul.f32 %v914_v20, %v2155_v46  ;;  %v2269_v48 = vmul.f32 %v914_v20, %v2157_v47 }
  0xab   : > { %v932_v6 = vmul.f32 %v914_v20, %v2163_v50  ;;  %v933_v7 = vmul.f32 %v914_v20, %v2165_v51  ;;  %v934_v9 = vmul.f32 %v914_v20, %v2167_v52  ;;  %v935_v10 = vmul.f32 %v914_v20, %v2169_v53 }
  0xac   : > { %v936_v11 = vmul.f32 %v914_v20, %v2171_v55  ;;  %v937_v12 = vmul.f32 %v914_v20, %v2173_v56  ;;  %v938_v13 = vmul.f32 %v914_v20, %v2175_v57  ;;  %v939_v14 = vmul.f32 %v914_v20, %v2177_v58 }
  0xad   : > { %v940_v15 = vsub.f32 %v2231_v37, %v932_v6  ;;  %v941_v16 = vsub.f32 %v2233_v34, %v933_v7  ;;  %v942_v17 = vsub.f32 %v2235_v33, %v934_v9  ;;  %v943_v18 = vsub.f32 %v2237_v32, %v935_v10 }
  0xae   : > { %v944_v19 = vsub.f32 %v2239_v31, %v936_v11  ;;  %v945_v54 = vsub.f32 %v2241_v8, %v937_v12  ;;  %v946_v55 = vsub.f32 %v2243_v0, %v938_v13  ;;  %v947_v56 = vsub.f32 %v2245_v1, %v939_v14 }
  0xaf   : > { %v948_v57 = vmul.f32 %v2197_v21, %v2197_v21  ;;  %v949_v20 = vmul.f32 %v2199_v22, %v2199_v22  ;;  %v950_v6 = vmul.f32 %v2201_v23, %v2201_v23  ;;  %v951_v7 = vmul.f32 %v2203_v24, %v2203_v24 }
  0xb0   : > { %v952_v9 = vmul.f32 %v2207_v59, %v2207_v59  ;;  %v953_v10 = vmul.f32 %v2209_v60, %v2209_v60  ;;  %v954_v11 = vmul.f32 %v2211_v61, %v2211_v61  ;;  %v955_v12 = vmul.f32 %v2213_v62, %v2213_v62 }
  0xb1   : > { %v956_v13 = vmul.f32 %v2231_v37, %v2231_v37  ;;  %v957_v14 = vmul.f32 %v2233_v34, %v2233_v34  ;;  %v958_v58 = vmul.f32 %v2235_v33, %v2235_v33  ;;  %v959_v53 = vmul.f32 %v2237_v32, %v2237_v32 }
  0xb2   : > { %v960_v52 = vmul.f32 %v2239_v31, %v2239_v31  ;;  %v961_v51 = vmul.f32 %v2241_v8, %v2241_v8  ;;  %v962_v50 = vmul.f32 %v2243_v0, %v2243_v0  ;;  %v963_v47 = vmul.f32 %v2245_v1, %v2245_v1 }
  0xb3   : > { %v964_v46 = vadd.f32 %v956_v13, %v948_v57  ;;  %v965_v45 = vadd.f32 %v957_v14, %v949_v20  ;;  %v2319_v44 = vadd.f32 %v958_v58, %v950_v6  ;;  %v2321_v43 = vadd.f32 %v959_v53, %v951_v7  ;;  %v901_v20 = vpop.permute.xlu0 %900 }
  0xb4   : > { %v2323_v41 = vadd.f32 %v960_v52, %v952_v9  ;;  %v2325_v40 = vadd.f32 %v961_v51, %v953_v10  ;;  %v2327_v39 = vadd.f32 %v962_v50, %v954_v11  ;;  %v2329_v36 = vadd.f32 %v963_v47, %v955_v12 }
  0xb5   : > { %1938 = vrcp.f32 %v964_v46  ;;  %v1012_v35 = vmul.f32 %v940_v15, %v2231_v37  ;;  %v1013_v30 = vmul.f32 %v941_v16, %v2233_v34  ;;  %v1014_v57 = vmul.f32 %v942_v17, %v2235_v33 }
  0xb6   : > { %1940 = vrcp.f32 %v965_v45  ;;  %v1015_v58 = vmul.f32 %v943_v18, %v2237_v32  ;;  %v1016_v53 = vmul.f32 %v944_v19, %v2239_v31  ;;  %v1017_v52 = vmul.f32 %v945_v54, %v2241_v8 }
  0xb7   : > { %1942 = vrcp.f32 %v2319_v44  ;;  %v1018_v50 = vmul.f32 %v946_v55, %v2243_v0  ;;  %v2340_v47 = vmul.f32 %v947_v56, %v2245_v1  ;;  %v2343_v51 = vmul.f32 %v940_v15, %v2197_v21 }
  0xb8   : > { %1944 = vrcp.f32 %v2321_v43  ;;  %v2347_v6 = vmul.f32 %v941_v16, %v2199_v22  ;;  %v2350_v7 = vmul.f32 %v942_v17, %v2201_v23  ;;  %v2353_v9 = vmul.f32 %v943_v18, %v2203_v24 }
  0xb9   : > { %1946 = vrcp.f32 %v2323_v41  ;;  %v2357_v10 = vmul.f32 %v944_v19, %v2207_v59  ;;  %v2360_v15 = vmul.f32 %v945_v54, %v2209_v60  ;;  %v2363_v11 = vmul.f32 %v946_v55, %v2211_v61 }
  0xba   : > { %1948 = vrcp.f32 %v2325_v40  ;;  %v2367_v16 = vmul.f32 %v947_v56, %v2213_v62  ;;  %v903_v17 = vadd.f32 %v901_v20, %v2197_v21  ;;  %v904_v18 = vadd.f32 %v901_v20, %v2199_v22 }
  0xbb   : > { %3088 = vst [vmem:[#allocation36_spill] sm:$0xff] %v2360_v15  ;;  %3089 = vst [vmem:[#allocation37_spill] sm:$0xff] %v2363_v11  ;;  %1950 = vrcp.f32 %v2327_v39  ;;  %v905_v19 = vadd.f32 %v901_v20, %v2201_v23  ;;  %v906_v12 = vadd.f32 %v901_v20, %v2203_v24  ;;  %v907_v54 = vadd.f32 %v901_v20, %v2207_v59 }
  0xbc   : > { %3090 = vst [vmem:[#allocation38_spill] sm:$0xff] %v2367_v16  ;;  %1952 = vrcp.f32 %v2329_v36  ;;  %v908_v55 = vadd.f32 %v901_v20, %v2209_v60  ;;  %v909_v13 = vadd.f32 %v901_v20, %v2211_v61  ;;  %v910_v56 = vadd.f32 %v901_v20, %v2213_v62 }
  0xbd   : > { %v924_v14 = vadd.f32 %v2248_v2, %v903_v17  ;;  %v925_v29 = vadd.f32 %v2251_v3, %v904_v18  ;;  %v926_v28 = vadd.f32 %v2254_v4, %v905_v19  ;;  %v927_v27 = vadd.f32 %v2257_v5, %v906_v12 }
  0xbe   : > { %v2384_v26 = vadd.f32 %v2260_v49, %v907_v54  ;;  %v2387_v63 = vadd.f32 %v2263_v42, %v908_v55  ;;  %v2390_v25 = vadd.f32 %v2266_v38, %v909_v13  ;;  %v2393_v16 = vadd.f32 %v2269_v48, %v910_v56 }
  0xbf   : > { %v1939_v20 = vpop.eup %1938  ;;  %v1004_v2 = vmul.f32 %v924_v14, %v2197_v21  ;;  %v1005_v3 = vmul.f32 %v925_v29, %v2199_v22  ;;  %v1006_v4 = vmul.f32 %v926_v28, %v2201_v23  ;;  %v1007_v5 = vmul.f32 %v927_v27, %v2203_v24 }
  0xc0   : > { %v1941_v49 = vpop.eup %1940  ;;  %v980_v17 = vmul.f32 %v1939_v20, %v964_v46  ;;  %v1008_v42 = vmul.f32 %v2384_v26, %v2207_v59  ;;  %v1009_v38 = vmul.f32 %v2387_v63, %v2209_v60  ;;  %v1010_v48 = vmul.f32 %v2390_v25, %v2211_v61 }
  0xc1   : > { %v1943_v18 = vpop.eup %1942  ;;  %v981_v19 = vmul.f32 %v1941_v49, %v965_v45  ;;  %v1011_v21 = vmul.f32 %v2393_v16, %v2213_v62  ;;  %v1020_v22 = vadd.f32 %v1012_v35, %v1004_v2  ;;  %v1021_v23 = vadd.f32 %v1013_v30, %v1005_v3 }
  0xc2   : > { %v1945_v12 = vpop.eup %1944  ;;  %v982_v24 = vmul.f32 %v1943_v18, %v2319_v44  ;;  %v988_v46 = vsub.f32 2.0, %v980_v17  ;;  %v1022_v54 = vadd.f32 %v1014_v57, %v1006_v4  ;;  %v1023_v55 = vadd.f32 %v1015_v58, %v1007_v5 }
  0xc3   : > { %v1947_v59 = vpop.eup %1946  ;;  %v983_v60 = vmul.f32 %v1945_v12, %v2321_v43  ;;  %v989_v13 = vsub.f32 2.0, %v981_v19  ;;  %v1024_v56 = vadd.f32 %v1016_v53, %v1008_v42  ;;  %v1025_v61 = vadd.f32 %v1017_v52, %v1009_v38 }
  0xc4   : > { %v1949_v11 = vpop.eup %1948  ;;  %v984_v45 = vmul.f32 %v1947_v59, %v2323_v41  ;;  %v990_v15 = vsub.f32 2.0, %v982_v24  ;;  %v996_v62 = vmul.f32 %v1939_v20, %v988_v46  ;;  %v1026_v35 = vadd.f32 %v1018_v50, %v1010_v48  ;;  %v3092_v24 = vld [vmem:[#allocation37_spill] sm:$0xff] }
  0xc5   : > { %v1951_v30 = vpop.eup %1950  ;;  %v985_v2 = vmul.f32 %v1949_v11, %v2325_v40  ;;  %v991_v44 = vsub.f32 2.0, %v983_v60  ;;  %v997_v3 = vmul.f32 %v1941_v49, %v989_v13  ;;  %v1027_v57 = vadd.f32 %v2340_v47, %v1011_v21 }
  0xc6   : > { %v1953_v58 = vpop.eup %1952  ;;  %v986_v43 = vmul.f32 %v1951_v30, %v2327_v39  ;;  %v992_v4 = vsub.f32 2.0, %v984_v45  ;;  %v998_v53 = vmul.f32 %v1943_v18, %v990_v15  ;;  %v2414_v52 = vmul.f32 %v1020_v22, %v996_v62  ;;  %v1079_v45 = vld [vmem:[%s2443_s16 + $0x18] sm:$0xff] }
  0xc7   : > { %v987_v41 = vmul.f32 %v1953_v58, %v2329_v36  ;;  %v993_v5 = vsub.f32 2.0, %v985_v2  ;;  %v999_v20 = vmul.f32 %v1945_v12, %v991_v44  ;;  %v2417_v50 = vmul.f32 %v1021_v23, %v997_v3  ;;  %v3091_v23 = vld [vmem:[#allocation36_spill] sm:$0xff] }
  0xc8   : > { %v994_v17 = vsub.f32 2.0, %v986_v43  ;;  %v1000_v40 = vmul.f32 %v1947_v59, %v992_v4  ;;  %v2419_v42 = vmul.f32 %v1022_v54, %v998_v53  ;;  %v1044_v47 = vmul.f32 %v924_v14, %v2231_v37  ;;  %v3093_v54 = vld [vmem:[#allocation38_spill] sm:$0xff]  ;;  %v1077_v59 = vld [vmem:[%s2443_s16 + $0x8] sm:$0xff]  ;;  %v1083_v43 = vld [vmem:[%s2443_s16 + $0x38] sm:$0xff] }
  0xc9   : > { %v995_v39 = vsub.f32 2.0, %v987_v41  ;;  %v1001_v15 = vmul.f32 %v1949_v11, %v993_v5  ;;  %v2427_v49 = vmul.f32 %v1023_v55, %v999_v20  ;;  %v1045_v36 = vmul.f32 %v925_v29, %v2233_v34  ;;  %v1069_v34 = vld [vmem:[%s2425_s26 + $0x8] sm:$0xff] }
  0xca   : > { %v1002_v38 = vmul.f32 %v1951_v30, %v994_v17  ;;  %v2430_v48 = vmul.f32 %v1024_v56, %v1000_v40  ;;  %v1046_v37 = vmul.f32 %v926_v28, %v2235_v33  ;;  %v1047_v14 = vmul.f32 %v927_v27, %v2237_v32  ;;  %v1068_v28 = vld [vmem:[%s2425_s26] sm:$0xff] }
  0xcb   : > { %v1003_v18 = vmul.f32 %v1953_v58, %v995_v39  ;;  %v2434_v19 = vmul.f32 %v1025_v61, %v1001_v15  ;;  %v1048_v11 = vmul.f32 %v2384_v26, %v2239_v31  ;;  %v1049_v29 = vmul.f32 %v2387_v63, %v2241_v8  ;;  %v1070_v63 = vld [vmem:[%s2425_s26 + $0x10] sm:$0xff]  ;;  %v1071_v31 = vld [vmem:[%s2425_s26 + $0x18] sm:$0xff] }
  0xcc   : > { %v2446_v33 = vmul.f32 %v1026_v35, %v1002_v38  ;;  %v1050_v27 = vmul.f32 %v2390_v25, %v2243_v0  ;;  %v1051_v32 = vmul.f32 %v2393_v16, %v2245_v1  ;;  %v1052_v26 = vsub.f32 %v2343_v51, %v1044_v47  ;;  %v1072_v0 = vld [vmem:[%s2425_s26 + $0x20] sm:$0xff]  ;;  %v1073_v1 = vld [vmem:[%s2425_s26 + $0x28] sm:$0xff]  ;;  %v1074_v16 = vld [vmem:[%s2425_s26 + $0x30] sm:$0xff] }
  0xcd   : > { %v2456_v8 = vmul.f32 %v1027_v57, %v1003_v18  ;;  %v1053_v21 = vsub.f32 %v2347_v6, %v1045_v36  ;;  %v1054_v22 = vsub.f32 %v2350_v7, %v1046_v37  ;;  %v1055_v25 = vsub.f32 %v2353_v9, %v1047_v14  ;;  %v1075_v6 = vld [vmem:[%s2425_s26 + $0x38] sm:$0xff]  ;;  %v1076_v7 = vld [vmem:[%s2443_s16] sm:$0xff]  ;;  %v1078_v61 = vld [vmem:[%s2443_s16 + $0x10] sm:$0xff] }
  0xce   : > { %v1056_v51 = vsub.f32 %v2357_v10, %v1048_v11  ;;  %v1057_v12 = vsub.f32 %v3091_v23, %v1049_v29  ;;  %v1058_v46 = vsub.f32 %v3092_v24, %v1050_v27  ;;  %v1059_v55 = vsub.f32 %v3093_v54, %v1051_v32  ;;  %v1080_v35 = vld [vmem:[%s2443_s16 + $0x20] sm:$0xff]  ;;  %v1081_v57 = vld [vmem:[%s2443_s16 + $0x28] sm:$0xff]  ;;  %v1082_v58 = vld [vmem:[%s2443_s16 + $0x30] sm:$0xff] }
  0xcf   : > { %v1060_v9 = vmul.f32 %v1052_v26, %v996_v62  ;;  %v1061_v60 = vmul.f32 %v1053_v21, %v997_v3  ;;  %v1062_v13 = vmul.f32 %v1054_v22, %v998_v53  ;;  %v1063_v56 = vmul.f32 %v1055_v25, %v999_v20  ;;  %v3149_v11 = vld [vmem:[#allocation31_spill] sm:$0xff] }
  0xd0   : > { %v1064_v10 = vmul.f32 %v1056_v51, %v1000_v40  ;;  %v1065_v30 = vmul.f32 %v1057_v12, %v1001_v15  ;;  %v1066_v2 = vmul.f32 %v1058_v46, %v1002_v38  ;;  %v1067_v44 = vmul.f32 %v1059_v55, %v1003_v18  ;;  %v3150_v18 = vld [vmem:[#allocation32_spill] sm:$0xff] }
  0xd1   : > { %v2478_v4 = vmul.f32 %v1068_v28, %v2414_v52  ;;  %v2481_v41 = vmul.f32 %v1069_v34, %v2417_v50  ;;  %v2484_v62 = vmul.f32 %v1070_v63, %v2419_v42  ;;  %v2487_v3 = vmul.f32 %v1071_v31, %v2427_v49 }
  0xd2   : > { %v2490_v53 = vmul.f32 %v1072_v0, %v2430_v48  ;;  %v2493_v5 = vmul.f32 %v1073_v1, %v2434_v19  ;;  %v2496_v20 = vmul.f32 %v1074_v16, %v2446_v33  ;;  %v2499_v17 = vmul.f32 %v1075_v6, %v2456_v8 }
  0xd3   : > { %3094 = vst [vmem:[#allocation36_spill] sm:$0xff] %v2478_v4  ;;  %3095 = vst [vmem:[#allocation37_spill] sm:$0xff] %v2481_v41  ;;  %v2501_v40 = vmul.f32 %v1076_v7, %v1060_v9  ;;  %v2503_v47 = vmul.f32 %v1077_v59, %v1061_v60  ;;  %v2505_v39 = vmul.f32 %v1078_v61, %v1062_v13 }
  0xd4   : > { %3096 = vst [vmem:[#allocation38_spill] sm:$0xff] %v2484_v62  ;;  %3097 = vst [vmem:[#allocation39_spill] sm:$0xff] %v2487_v3  ;;  %v2507_v15 = vmul.f32 %v1079_v45, %v1063_v56  ;;  %v2509_v36 = vmul.f32 %v1080_v35, %v1064_v10  ;;  %v2511_v38 = vmul.f32 %v1081_v57, %v1065_v30 }
  0xd5   : > { %3098 = vst [vmem:[#allocation40_spill] sm:$0xff] %v2490_v53  ;;  %3099 = vst [vmem:[#allocation41_spill] sm:$0xff] %v2493_v5  ;;  %v2513_v37 = vmul.f32 %v1082_v58, %v1066_v2  ;;  %v2515_v14 = vmul.f32 %v1083_v43, %v1067_v44  ;;  %v1140_v25 = vmul.f32 %v1068_v28, %v1060_v9 }
  0xd6   : > { %3100 = vst [vmem:[#allocation42_spill] sm:$0xff] %v2496_v20  ;;  %3101 = vst [vmem:[#allocation43_spill] sm:$0xff] %v2499_v17  ;;  %v1141_v51 = vmul.f32 %v1069_v34, %v1061_v60  ;;  %v1142_v23 = vmul.f32 %v1070_v63, %v1062_v13  ;;  %v1143_v12 = vmul.f32 %v1071_v31, %v1063_v56  ;;  %v3123_v60 = vld [vmem:[#allocation6_spill] sm:$0xff]  ;;  %v3124_v56 = vld [vmem:[#allocation7_spill] sm:$0xff] }
  0xd7   : > { %3102 = vst [vmem:[#allocation44_spill] sm:$0xff] %v2501_v40  ;;  %3103 = vst [vmem:[#allocation45_spill] sm:$0xff] %v2503_v47  ;;  %v1144_v24 = vmul.f32 %v1072_v0, %v1064_v10  ;;  %v1145_v46 = vmul.f32 %v1073_v1, %v1065_v30  ;;  %v1146_v54 = vmul.f32 %v1074_v16, %v1066_v2  ;;  %v3126_v10 = vld [vmem:[#allocation12_spill] sm:$0xff] }
  0xd8   : > { %3104 = vst [vmem:[#allocation46_spill] sm:$0xff] %v2505_v39  ;;  %3105 = vst [vmem:[#allocation47_spill] sm:$0xff] %v2507_v15  ;;  %v1147_v55 = vmul.f32 %v1075_v6, %v1067_v44  ;;  %v1148_v27 = vmul.f32 %v1076_v7, %v2414_v52  ;;  %v1149_v32 = vmul.f32 %v1077_v59, %v2417_v50  ;;  %v3121_v6 = vld [vmem:[#allocation4_spill] sm:$0xff]  ;;  %v3122_v59 = vld [vmem:[#allocation5_spill] sm:$0xff] }
  0xd9   : > { %3106 = vst [vmem:[#allocation48_spill] sm:$0xff] %v2509_v36  ;;  %3107 = vst [vmem:[#allocation49_spill] sm:$0xff] %v2511_v38  ;;  %v1150_v26 = vmul.f32 %v1078_v61, %v2419_v42  ;;  %v1151_v29 = vmul.f32 %v1079_v45, %v2427_v49  ;;  %v1152_v21 = vmul.f32 %v1080_v35, %v2430_v48  ;;  %v3125_v45 = vld [vmem:[#allocation11_spill] sm:$0xff] }
  0xda   : > { %3108 = vst [vmem:[#allocation50_spill] sm:$0xff] %v2513_v37  ;;  %3109 = vst [vmem:[#allocation51_spill] sm:$0xff] %v2515_v14  ;;  %v1153_v22 = vmul.f32 %v1081_v57, %v2434_v19  ;;  %v1154_v28 = vmul.f32 %v1082_v58, %v2446_v33  ;;  %v1155_v34 = vmul.f32 %v1083_v43, %v2456_v8  ;;  %v3118_v19 = vld [vmem:[#allocation2_spill] sm:$0xff]  ;;  %v3120_v8 = vld [vmem:[#allocation3_spill] sm:$0xff] }
  0xdb   : > { %v2541_v63 = vadd.f32 %v1148_v27, %v1140_v25  ;;  %v2543_v31 = vadd.f32 %v1149_v32, %v1141_v51  ;;  %v2545_v0 = vadd.f32 %v1150_v26, %v1142_v23  ;;  %v2547_v52 = vadd.f32 %v1151_v29, %v1143_v12  ;;  %v3119_v33 = vld [vmem:[#allocation34_spill] sm:$0xff]  ;;  %v3127_v26 = vld [vmem:[#allocation15_spill] sm:$0xff]  ;;  %v3129_v25 = vld [vmem:[#allocation16_spill] sm:$0xff] }
  0xdc   : > { %v2549_v50 = vadd.f32 %v1152_v21, %v1144_v24  ;;  %v2551_v42 = vadd.f32 %v1153_v22, %v1145_v46  ;;  %v2553_v49 = vadd.f32 %v1154_v28, %v1146_v54  ;;  %v2555_v48 = vadd.f32 %v1155_v34, %v1147_v55  ;;  %v3128_v21 = vld [vmem:[#allocation35_spill] sm:$0xff]  ;;  %v3130_v23 = vld [vmem:[#allocation17_spill] sm:$0xff]  ;;  %v3132_v54 = vld [vmem:[#allocation20_spill] sm:$0xff] }
  0xdd   : > { %3110 = vst [vmem:[#allocation52_spill] sm:$0xff] %v2541_v63  ;;  %3111 = vst [vmem:[#allocation53_spill] sm:$0xff] %v2543_v31  ;;  %v1193_v1 = vmul.f32 %v3119_v33, %v3118_v19  ;;  %v1194_v16 = vmul.f32 %v3119_v33, %v3120_v8  ;;  %v1195_v7 = vmul.f32 %v3119_v33, %v3121_v6  ;;  %v3131_v24 = vld [vmem:[#allocation19_spill] sm:$0xff]  ;;  %v3133_v28 = vld [vmem:[#allocation21_spill] sm:$0xff] }
  0xde   : > { %3112 = vst [vmem:[#allocation54_spill] sm:$0xff] %v2545_v0  ;;  %3113 = vst [vmem:[#allocation55_spill] sm:$0xff] %v2547_v52  ;;  %v1196_v9 = vmul.f32 %v3119_v33, %v3122_v59  ;;  %v1197_v13 = vmul.f32 %v3119_v33, %v3123_v60  ;;  %v1198_v61 = vmul.f32 %v3119_v33, %v3124_v56  ;;  %v3134_v19 = vld [vmem:[#allocation22_spill] sm:$0xff]  ;;  %v3135_v8 = vld [vmem:[#allocation23_spill] sm:$0xff]  ;;  %v1278_v0 = vpop.permute.xlu1 %1277 }
  0xdf   : > { %3114 = vst [vmem:[#allocation56_spill] sm:$0xff] %v2549_v50  ;;  %3115 = vst [vmem:[#allocation57_spill] sm:$0xff] %v2551_v42  ;;  %v1199_v35 = vmul.f32 %v3119_v33, %v3125_v45  ;;  %v1200_v30 = vmul.f32 %v3119_v33, %v3126_v10  ;;  %v1201_v2 = vadd.f32 1.0, %v1193_v1  ;;  %v1202_v44 = vadd.f32 1.0, %v1194_v16  ;;  %v3136_v45 = vld [vmem:[#allocation8_spill] sm:$0xff]  ;;  %v3137_v10 = vld [vmem:[#allocation9_spill] sm:$0xff] }
  0xe0   : > { %3116 = vst [vmem:[#allocation58_spill] sm:$0xff] %v2553_v49  ;;  %3117 = vst [vmem:[#allocation59_spill] sm:$0xff] %v2555_v48  ;;  %v1203_v57 = vadd.f32 1.0, %v1195_v7  ;;  %v1204_v58 = vadd.f32 1.0, %v1196_v9  ;;  %v1205_v43 = vadd.f32 1.0, %v1197_v13  ;;  %v1206_v29 = vadd.f32 1.0, %v1198_v61 }
  0xe1   : > { %v1207_v27 = vadd.f32 1.0, %v1199_v35  ;;  %v1208_v32 = vadd.f32 1.0, %v1200_v30  ;;  %v1214_v22 = vmul.f32 %v3128_v21, %v3127_v26  ;;  %v1215_v51 = vmul.f32 %v3128_v21, %v3129_v25 }
  0xe2   : > { %v1216_v12 = vmul.f32 %v3128_v21, %v3130_v23  ;;  %v1217_v46 = vmul.f32 %v3128_v21, %v3131_v24  ;;  %v1218_v55 = vmul.f32 %v3128_v21, %v3132_v54  ;;  %v1219_v34 = vmul.f32 %v3128_v21, %v3133_v28 }
  0xe3   : > { %v1220_v1 = vmul.f32 %v3128_v21, %v3134_v19  ;;  %v1221_v16 = vmul.f32 %v3128_v21, %v3135_v8  ;;  %v2589_v6 = vadd.f32 %v1214_v22, %v1201_v2  ;;  %v2591_v7 = vadd.f32 %v1215_v51, %v1202_v44  ;;  %v3138_v2 = vld [vmem:[#allocation10_spill] sm:$0xff] }
  0xe4   : > { %v2593_v59 = vadd.f32 %v1216_v12, %v1203_v57  ;;  %v2595_v9 = vadd.f32 %v1217_v46, %v1204_v58  ;;  %v2597_v60 = vadd.f32 %v1218_v55, %v1205_v43  ;;  %v2599_v13 = vadd.f32 %v1219_v34, %v1206_v29  ;;  %v3139_v57 = vld [vmem:[#allocation13_spill] sm:$0xff]  ;;  %v3140_v43 = vld [vmem:[#allocation14_spill] sm:$0xff] }
  0xe5   : > { %v2601_v56 = vadd.f32 %v1220_v1, %v1207_v27  ;;  %v2603_v61 = vadd.f32 %v1221_v16, %v1208_v32  ;;  %v1230_v35 = vmul.f32 %v3119_v33, %v3136_v45  ;;  %v1231_v30 = vmul.f32 %v3119_v33, %v3137_v10  ;;  %v3141_v22 = vld [vmem:[#allocation18_spill] sm:$0xff]  ;;  %v3142_v32 = vld [vmem:[#allocation24_spill] sm:$0xff]  ;;  %v3143_v12 = vld [vmem:[#allocation25_spill] sm:$0xff] }
  0xe6   : > { %v1232_v44 = vmul.f32 %v3119_v33, %v3138_v2  ;;  %v1233_v58 = vmul.f32 %v3119_v33, %v3139_v57  ;;  %v1234_v29 = vmul.f32 %v3119_v33, %v3140_v43  ;;  %v1235_v27 = vmul.f32 %v3119_v33, %v3141_v22  ;;  %v3144_v55 = vld [vmem:[#allocation26_spill] sm:$0xff]  ;;  %v3145_v1 = vld [vmem:[#allocation27_spill] sm:$0xff]  ;;  %v3146_v45 = vld [vmem:[#allocation28_spill] sm:$0xff] }
  0xe7   : > { %v1236_v51 = vmul.f32 %v3119_v33, %v3142_v32  ;;  %v1237_v46 = vmul.f32 %v3119_v33, %v3143_v12  ;;  %v1238_v34 = vmul.f32 %v3128_v21, %v3144_v55  ;;  %v1239_v16 = vmul.f32 %v3128_v21, %v3145_v1  ;;  %v3147_v2 = vld [vmem:[#allocation29_spill] sm:$0xff]  ;;  %v3148_v43 = vld [vmem:[#allocation30_spill] sm:$0xff] }
  0xe8   : > { %v1240_v10 = vmul.f32 %v3128_v21, %v3146_v45  ;;  %v1241_v57 = vmul.f32 %v3128_v21, %v3147_v2  ;;  %v1242_v22 = vmul.f32 %v3128_v21, %v3148_v43  ;;  %v1243_v32 = vmul.f32 %v3128_v21, %v3149_v11  ;;  %v3151_v12 = vld [vmem:[#allocation33_spill] sm:$0xff] }
  0xe9   : > { %v1244_v33 = vmul.f32 %v3128_v21, %v3150_v18  ;;  %v1245_v48 = vmul.f32 %v3128_v21, %v3151_v12  ;;  %v1246_v49 = vadd.f32 %v1238_v34, %v1230_v35  ;;  %v1247_v42 = vadd.f32 %v1239_v16, %v1231_v30 }
  0xea   : > { %v1248_v50 = vadd.f32 %v1240_v10, %v1232_v44  ;;  %v1249_v52 = vadd.f32 %v1241_v57, %v1233_v58  ;;  %v1250_v31 = vadd.f32 %v1242_v22, %v1234_v29  ;;  %v1251_v63 = vadd.f32 %v1243_v32, %v1235_v27 }
  0xeb   : > { %v1252_v14 = vadd.f32 %v1244_v33, %v1236_v51  ;;  %v1253_v17 = vadd.f32 %v1245_v48, %v1237_v46  ;;  %v2637_v37 = vsub.f32 0.0, %v1246_v49  ;;  %v2639_v20 = vsub.f32 0.0, %v1247_v42 }
  0xec   : > { %v2641_v38 = vsub.f32 0.0, %v1248_v50  ;;  %v2643_v5 = vsub.f32 0.0, %v1249_v52  ;;  %v2645_v36 = vsub.f32 0.0, %v1250_v31  ;;  %v2647_v21 = vsub.f32 0.0, %v1251_v63 }
  0xed   : > { %v2649_v35 = vsub.f32 0.0, %v1252_v14  ;;  %v2651_v30 = vsub.f32 0.0, %v1253_v17  ;;  %v2654_v44 = vmul.f32 %v1278_v0, %v3127_v26  ;;  %v2657_v49 = vmul.f32 %v1278_v0, %v3129_v25 }
  0xee   : > { %v2660_v42 = vmul.f32 %v1278_v0, %v3130_v23  ;;  %v2663_v52 = vmul.f32 %v1278_v0, %v3131_v24  ;;  %v2666_v31 = vmul.f32 %v1278_v0, %v3132_v54  ;;  %v2669_v14 = vmul.f32 %v1278_v0, %v3133_v28 }
  0xef   : > { %v2672_v17 = vmul.f32 %v1278_v0, %v3134_v19  ;;  %v2675_v63 = vmul.f32 %v1278_v0, %v3135_v8  ;;  %v1296_v50 = vmul.f32 %v1278_v0, %v3144_v55  ;;  %v1297_v48 = vmul.f32 %v1278_v0, %v3145_v1 }
  0xf0   : > { %v1298_v26 = vmul.f32 %v1278_v0, %v3146_v45  ;;  %v1299_v25 = vmul.f32 %v1278_v0, %v3147_v2  ;;  %v1300_v23 = vmul.f32 %v1278_v0, %v3148_v43  ;;  %v1301_v24 = vmul.f32 %v1278_v0, %v3149_v11 }
  0xf1   : > { %v1302_v54 = vmul.f32 %v1278_v0, %v3150_v18  ;;  %v1303_v28 = vmul.f32 %v1278_v0, %v3151_v12  ;;  %v1304_v19 = vsub.f32 %v2637_v37, %v1296_v50  ;;  %v1305_v8 = vsub.f32 %v2639_v20, %v1297_v48 }
  0xf2   : > { %v1306_v58 = vsub.f32 %v2641_v38, %v1298_v26  ;;  %v1307_v29 = vsub.f32 %v2643_v5, %v1299_v25  ;;  %v1308_v27 = vsub.f32 %v2645_v36, %v1300_v23  ;;  %v1309_v51 = vsub.f32 %v2647_v21, %v1301_v24 }
  0xf3   : > { %v1310_v46 = vsub.f32 %v2649_v35, %v1302_v54  ;;  %v1311_v11 = vsub.f32 %v2651_v30, %v1303_v28  ;;  %v1312_v18 = vmul.f32 %v2589_v6, %v2589_v6  ;;  %v1313_v0 = vmul.f32 %v2591_v7, %v2591_v7 }
  0xf4   : > { %v1314_v55 = vmul.f32 %v2593_v59, %v2593_v59  ;;  %v1315_v34 = vmul.f32 %v2595_v9, %v2595_v9  ;;  %v1316_v1 = vmul.f32 %v2597_v60, %v2597_v60  ;;  %v1317_v16 = vmul.f32 %v2599_v13, %v2599_v13 }
  0xf5   : > { %v1318_v45 = vmul.f32 %v2601_v56, %v2601_v56  ;;  %v1319_v10 = vmul.f32 %v2603_v61, %v2603_v61  ;;  %v1320_v2 = vmul.f32 %v2637_v37, %v2637_v37  ;;  %v1321_v57 = vmul.f32 %v2639_v20, %v2639_v20 }
  0xf6   : > { %v1322_v43 = vmul.f32 %v2641_v38, %v2641_v38  ;;  %v1323_v22 = vmul.f32 %v2643_v5, %v2643_v5  ;;  %v1324_v32 = vmul.f32 %v2645_v36, %v2645_v36  ;;  %v1325_v33 = vmul.f32 %v2647_v21, %v2647_v21 }
  0xf7   : > { %v1326_v12 = vmul.f32 %v2649_v35, %v2649_v35  ;;  %v1327_v50 = vmul.f32 %v2651_v30, %v2651_v30  ;;  %v1328_v48 = vadd.f32 %v1320_v2, %v1312_v18  ;;  %v1329_v26 = vadd.f32 %v1321_v57, %v1313_v0 }
  0xf8   : > { %v2725_v25 = vadd.f32 %v1322_v43, %v1314_v55  ;;  %v2727_v23 = vadd.f32 %v1323_v22, %v1315_v34  ;;  %v2729_v24 = vadd.f32 %v1324_v32, %v1316_v1  ;;  %v2731_v54 = vadd.f32 %v1325_v33, %v1317_v16 }
  0xf9   : > { %v2733_v28 = vadd.f32 %v1326_v12, %v1318_v45  ;;  %v2735_v53 = vadd.f32 %v1327_v50, %v1319_v10  ;;  %1954 = vrcp.f32 %v1328_v48  ;;  %v1376_v15 = vmul.f32 %v1304_v19, %v2637_v37  ;;  %v1265_v10 = vpop.permute.xlu0 %1264 }
  0xfa   : > { %v1377_v3 = vmul.f32 %v1305_v8, %v2639_v20  ;;  %v1378_v18 = vmul.f32 %v1306_v58, %v2641_v38  ;;  %1956 = vrcp.f32 %v1329_v26  ;;  %v1379_v0 = vmul.f32 %v1307_v29, %v2643_v5 }
  0xfb   : > { %v1380_v55 = vmul.f32 %v1308_v27, %v2645_v36  ;;  %v1381_v34 = vmul.f32 %v1309_v51, %v2647_v21  ;;  %1958 = vrcp.f32 %v2725_v25  ;;  %v1382_v1 = vmul.f32 %v1310_v46, %v2649_v35 }
  0xfc   : > { %v2746_v16 = vmul.f32 %v1311_v11, %v2651_v30  ;;  %v2749_v45 = vmul.f32 %v1304_v19, %v2589_v6  ;;  %1960 = vrcp.f32 %v2727_v23  ;;  %v2753_v2 = vmul.f32 %v1305_v8, %v2591_v7 }
  0xfd   : > { %v2756_v57 = vmul.f32 %v1306_v58, %v2593_v59  ;;  %v2759_v43 = vmul.f32 %v1307_v29, %v2595_v9  ;;  %1962 = vrcp.f32 %v2729_v24  ;;  %v2763_v22 = vmul.f32 %v1308_v27, %v2597_v60 }
  0xfe   : > { %v2766_v19 = vmul.f32 %v1309_v51, %v2599_v13  ;;  %v2769_v32 = vmul.f32 %v1310_v46, %v2601_v56  ;;  %1964 = vrcp.f32 %v2731_v54  ;;  %v2773_v8 = vmul.f32 %v1311_v11, %v2603_v61 }
  0xff   : > { %3152 = vst [vmem:[#allocation2_spill] sm:$0xff] %v2763_v22  ;;  %v1267_v58 = vadd.f32 %v1265_v10, %v2589_v6  ;;  %v1268_v29 = vadd.f32 %v1265_v10, %v2591_v7  ;;  %1966 = vrcp.f32 %v2733_v28  ;;  %v1269_v27 = vadd.f32 %v1265_v10, %v2593_v59 }
 0x100   : > { %3153 = vst [vmem:[#allocation34_spill] sm:$0xff] %v2766_v19  ;;  %3154 = vst [vmem:[#allocation3_spill] sm:$0xff] %v2769_v32  ;;  %v1270_v33 = vadd.f32 %v1265_v10, %v2595_v9  ;;  %v1271_v51 = vadd.f32 %v1265_v10, %v2597_v60  ;;  %1968 = vrcp.f32 %v2735_v53  ;;  %v1272_v46 = vadd.f32 %v1265_v10, %v2599_v13 }
 0x101   : > { %3155 = vst [vmem:[#allocation4_spill] sm:$0xff] %v2773_v8  ;;  %v1273_v12 = vadd.f32 %v1265_v10, %v2601_v56  ;;  %v1274_v11 = vadd.f32 %v1265_v10, %v2603_v61  ;;  %v1288_v50 = vadd.f32 %v2654_v44, %v1267_v58  ;;  %v1289_v39 = vadd.f32 %v2657_v49, %v1268_v29 }
 0x102   : > { %v1290_v62 = vadd.f32 %v2660_v42, %v1269_v27  ;;  %v1291_v47 = vadd.f32 %v2663_v52, %v1270_v33  ;;  %v1292_v41 = vadd.f32 %v2666_v31, %v1271_v51  ;;  %v1293_v40 = vadd.f32 %v2669_v14, %v1272_v46 }
 0x103   : > { %v2792_v4 = vadd.f32 %v2672_v17, %v1273_v12  ;;  %v2795_v8 = vadd.f32 %v2675_v63, %v1274_v11  ;;  %v1955_v32 = vpop.eup %1954  ;;  %v1368_v10 = vmul.f32 %v1288_v50, %v2589_v6  ;;  %v1369_v44 = vmul.f32 %v1289_v39, %v2591_v7 }
 0x104   : > { %v1370_v49 = vmul.f32 %v1290_v62, %v2593_v59  ;;  %v1371_v42 = vmul.f32 %v1291_v47, %v2595_v9  ;;  %v1957_v52 = vpop.eup %1956  ;;  %v1344_v58 = vmul.f32 %v1955_v32, %v1328_v48  ;;  %v1372_v31 = vmul.f32 %v1292_v41, %v2597_v60 }
 0x105   : > { %v1373_v14 = vmul.f32 %v1293_v40, %v2599_v13  ;;  %v1374_v17 = vmul.f32 %v2792_v4, %v2601_v56  ;;  %v1959_v63 = vpop.eup %1958  ;;  %v1345_v29 = vmul.f32 %v1957_v52, %v1329_v26  ;;  %v1375_v6 = vmul.f32 %v2795_v8, %v2603_v61 }
 0x106   : > { %v1384_v27 = vadd.f32 %v1376_v15, %v1368_v10  ;;  %v1385_v7 = vadd.f32 %v1377_v3, %v1369_v44  ;;  %v1961_v33 = vpop.eup %1960  ;;  %v1346_v59 = vmul.f32 %v1959_v63, %v2725_v25  ;;  %v1352_v9 = vsub.f32 2.0, %v1344_v58 }
 0x107   : > { %v1386_v51 = vadd.f32 %v1378_v18, %v1370_v49  ;;  %v1387_v48 = vadd.f32 %v1379_v0, %v1371_v42  ;;  %v1963_v46 = vpop.eup %1962  ;;  %v1347_v60 = vmul.f32 %v1961_v33, %v2727_v23  ;;  %v1353_v13 = vsub.f32 2.0, %v1345_v29 }
 0x108   : > { %v1388_v12 = vadd.f32 %v1380_v55, %v1372_v31  ;;  %v1389_v11 = vadd.f32 %v1381_v34, %v1373_v14  ;;  %v1965_v56 = vpop.eup %1964  ;;  %v1348_v26 = vmul.f32 %v1963_v46, %v2729_v24  ;;  %v1354_v19 = vsub.f32 2.0, %v1346_v59 }
 0x109   : > { %v1360_v22 = vmul.f32 %v1955_v32, %v1352_v9  ;;  %v1390_v61 = vadd.f32 %v1382_v1, %v1374_v17  ;;  %v1967_v15 = vpop.eup %1966  ;;  %v1349_v3 = vmul.f32 %v1965_v56, %v2731_v54  ;;  %v1355_v10 = vsub.f32 2.0, %v1347_v60  ;;  %v3158_v9 = vld [vmem:[#allocation3_spill] sm:$0xff] }
 0x10a   : > { %v1361_v25 = vmul.f32 %v1957_v52, %v1353_v13  ;;  %v1391_v18 = vadd.f32 %v2746_v16, %v1375_v6  ;;  %v1969_v0 = vpop.eup %1968  ;;  %v1350_v44 = vmul.f32 %v1967_v15, %v2733_v28  ;;  %v1356_v23 = vsub.f32 2.0, %v1348_v26  ;;  %v1883_v26 = vld [vmem:[%s2443_s16 + $0x58] sm:$0xff] }
 0x10b   : > { %v1362_v49 = vmul.f32 %v1959_v63, %v1354_v19  ;;  %v2813_v55 = vmul.f32 %v1384_v27, %v1360_v22  ;;  %v1351_v34 = vmul.f32 %v1969_v0, %v2735_v53  ;;  %v1357_v24 = vsub.f32 2.0, %v1349_v3  ;;  %v2833_v27 = vld [vmem:[%s2425_s26 + $0x40] sm:$0xff] }
 0x10c   : > { %v1363_v42 = vmul.f32 %v1961_v33, %v1355_v10  ;;  %v2816_v32 = vmul.f32 %v1385_v7, %v1361_v25  ;;  %v1358_v1 = vsub.f32 2.0, %v1350_v44  ;;  %v1364_v54 = vmul.f32 %v1963_v46, %v1356_v23  ;;  %v3157_v33 = vld [vmem:[#allocation34_spill] sm:$0xff]  ;;  %v2876_v46 = vld [vmem:[%s2443_s16 + $0x48] sm:$0xff]  ;;  %v1886_v44 = vld [vmem:[%s2443_s16 + $0x70] sm:$0xff] }
 0x10d   : > { %v2818_v58 = vmul.f32 %v1386_v51, %v1362_v49  ;;  %v1408_v16 = vmul.f32 %v1288_v50, %v2637_v37  ;;  %v1359_v52 = vsub.f32 2.0, %v1351_v34  ;;  %v1365_v31 = vmul.f32 %v1965_v56, %v1357_v24  ;;  %v1882_v56 = vld [vmem:[%s2443_s16 + $0x50] sm:$0xff]  ;;  %v1887_v23 = vld [vmem:[%s2443_s16 + $0x78] sm:$0xff] }
 0x10e   : > { %v2821_v28 = vmul.f32 %v1387_v48, %v1363_v42  ;;  %v1409_v19 = vmul.f32 %v1289_v39, %v2639_v20  ;;  %v1366_v53 = vmul.f32 %v1967_v15, %v1358_v1  ;;  %v2824_v14 = vmul.f32 %v1388_v12, %v1364_v54  ;;  %v2870_v48 = vld [vmem:[%s2425_s26 + $0x78] sm:$0xff] }
 0x10f   : > { %v1410_v17 = vmul.f32 %v1290_v62, %v2641_v38  ;;  %v1411_v63 = vmul.f32 %v1291_v47, %v2643_v5  ;;  %v1367_v29 = vmul.f32 %v1969_v0, %v1359_v52  ;;  %v2828_v6 = vmul.f32 %v1389_v11, %v1365_v31  ;;  %v2843_v47 = vld [vmem:[%s2425_s26 + $0x48] sm:$0xff] }
 0x110   : > { %v1412_v37 = vmul.f32 %v1292_v41, %v2645_v36  ;;  %v1413_v50 = vmul.f32 %v1293_v40, %v2647_v21  ;;  %v2835_v20 = vmul.f32 %v1390_v61, %v1366_v53  ;;  %v1414_v39 = vmul.f32 %v2792_v4, %v2649_v35  ;;  %v2846_v41 = vld [vmem:[%s2425_s26 + $0x50] sm:$0xff]  ;;  %v2849_v40 = vld [vmem:[%s2425_s26 + $0x58] sm:$0xff]  ;;  %v2857_v35 = vld [vmem:[%s2425_s26 + $0x60] sm:$0xff] }
 0x111   : > { %v1415_v62 = vmul.f32 %v2795_v8, %v2651_v30  ;;  %v1416_v5 = vsub.f32 %v2749_v45, %v1408_v16  ;;  %v2851_v36 = vmul.f32 %v1391_v18, %v1367_v29  ;;  %v1417_v38 = vsub.f32 %v2753_v2, %v1409_v19  ;;  %v2860_v30 = vld [vmem:[%s2425_s26 + $0x68] sm:$0xff]  ;;  %v2863_v45 = vld [vmem:[%s2425_s26 + $0x70] sm:$0xff]  ;;  %v3156_v8 = vld [vmem:[#allocation2_spill] sm:$0xff] }
 0x112   : > { %v1418_v4 = vsub.f32 %v2756_v57, %v1410_v17  ;;  %v1419_v21 = vsub.f32 %v2759_v43, %v1411_v63  ;;  %v1420_v7 = vsub.f32 %v3156_v8, %v1412_v37  ;;  %v1421_v59 = vsub.f32 %v3157_v33, %v1413_v50  ;;  %v3159_v2 = vld [vmem:[#allocation4_spill] sm:$0xff]  ;;  %v2873_v43 = vld [vmem:[%s2443_s16 + $0x40] sm:$0xff]  ;;  %v1885_v0 = vld [vmem:[%s2443_s16 + $0x68] sm:$0xff] }
 0x113   : > { %v1422_v51 = vsub.f32 %v3158_v9, %v1414_v39  ;;  %v1423_v57 = vsub.f32 %v3159_v2, %v1415_v62  ;;  %v1424_v60 = vmul.f32 %v1416_v5, %v1360_v22  ;;  %v1425_v13 = vmul.f32 %v1417_v38, %v1361_v25  ;;  %v1884_v61 = vld [vmem:[%s2443_s16 + $0x60] sm:$0xff]  ;;  %v3160_v8 = vld [vmem:[#allocation36_spill] sm:$0xff]  ;;  %v3163_v9 = vld [vmem:[#allocation37_spill] sm:$0xff] }
 0x114   : > { %v1426_v12 = vmul.f32 %v1418_v4, %v1362_v49  ;;  %v1427_v11 = vmul.f32 %v1419_v21, %v1363_v42  ;;  %v1428_v15 = vmul.f32 %v1420_v7, %v1364_v54  ;;  %v1429_v3 = vmul.f32 %v1421_v59, %v1365_v31  ;;  %v3161_v7 = vld [vmem:[#allocation44_spill] sm:$0xff] }
 0x115   : > { %v1430_v10 = vmul.f32 %v1422_v51, %v1366_v53  ;;  %v1431_v18 = vmul.f32 %v1423_v57, %v1367_v29  ;;  %v1458_v34 = vmul.f32 %v2833_v27, %v2813_v55  ;;  %v1459_v22 = vmul.f32 %v2843_v47, %v2816_v32  ;;  %v3164_v51 = vld [vmem:[#allocation45_spill] sm:$0xff] }
 0x116   : > { %v1460_v25 = vmul.f32 %v2846_v41, %v2818_v58  ;;  %v1461_v49 = vmul.f32 %v2849_v40, %v2821_v28  ;;  %v1462_v24 = vmul.f32 %v2857_v35, %v2824_v14  ;;  %v1463_v42 = vmul.f32 %v2860_v30, %v2828_v6 }
 0x117   : > { %v1464_v1 = vmul.f32 %v2863_v45, %v2835_v20  ;;  %v1465_v54 = vmul.f32 %v2870_v48, %v2851_v36  ;;  %v1466_v16 = vmul.f32 %v2873_v43, %v1424_v60  ;;  %v1467_v52 = vmul.f32 %v2876_v46, %v1425_v13 }
 0x118   : > { %v1468_v31 = vmul.f32 %v1882_v56, %v1426_v12  ;;  %v1469_v19 = vmul.f32 %v1883_v26, %v1427_v11  ;;  %v1470_v53 = vmul.f32 %v1884_v61, %v1428_v15  ;;  %v1471_v17 = vmul.f32 %v1885_v0, %v1429_v3 }
 0x119   : > { %v1472_v63 = vmul.f32 %v1886_v44, %v1430_v10  ;;  %v1473_v29 = vmul.f32 %v1887_v23, %v1431_v18  ;;  %v1474_v37 = vsub.f32 %v1458_v34, %v1466_v16  ;;  %v1475_v50 = vsub.f32 %v1459_v22, %v1467_v52  ;;  %v3166_v34 = vld [vmem:[#allocation38_spill] sm:$0xff]  ;;  %v3169_v16 = vld [vmem:[#allocation39_spill] sm:$0xff] }
 0x11a   : > { %v1476_v39 = vsub.f32 %v1460_v25, %v1468_v31  ;;  %v1477_v62 = vsub.f32 %v1461_v49, %v1469_v19  ;;  %v1478_v5 = vsub.f32 %v1462_v24, %v1470_v53  ;;  %v1479_v38 = vsub.f32 %v1463_v42, %v1471_v17  ;;  %v3167_v22 = vld [vmem:[#allocation46_spill] sm:$0xff]  ;;  %v3170_v52 = vld [vmem:[#allocation47_spill] sm:$0xff]  ;;  %v3172_v24 = vld [vmem:[#allocation40_spill] sm:$0xff] }
 0x11b   : > { %v1480_v4 = vsub.f32 %v1464_v1, %v1472_v63  ;;  %v1481_v21 = vsub.f32 %v1465_v54, %v1473_v29  ;;  %v3162_v33 = vsub.f32 %v3160_v8, %v3161_v7  ;;  %v3165_v2 = vsub.f32 %v3163_v9, %v3164_v51  ;;  %v3173_v42 = vld [vmem:[#allocation48_spill] sm:$0xff]  ;;  %v3175_v53 = vld [vmem:[#allocation41_spill] sm:$0xff]  ;;  %v3179_v8 = vld [vmem:[#allocation50_spill] sm:$0xff] }
 0x11c   : > { %v3168_v25 = vsub.f32 %v3166_v34, %v3167_v22  ;;  %v3171_v31 = vsub.f32 %v3169_v16, %v3170_v52  ;;  %v3174_v1 = vsub.f32 %v3172_v24, %v3173_v42  ;;  %v3176_v17 = vld [vmem:[#allocation49_spill] sm:$0xff]  ;;  %v3182_v9 = vld [vmem:[#allocation51_spill] sm:$0xff] }
 0x11d   : > { %v1482_v59 = vadd.f32 %v1474_v37, %v3162_v33  ;;  %v1483_v57 = vadd.f32 %v1475_v50, %v3165_v2  ;;  %v3177_v63 = vsub.f32 %v3175_v53, %v3176_v17  ;;  %v3178_v37 = vld [vmem:[#allocation42_spill] sm:$0xff]  ;;  %v3181_v33 = vld [vmem:[#allocation43_spill] sm:$0xff]  ;;  %v1508_v2 = vmul.f32 %v2846_v41, %v1426_v12 }
 0x11e   : > { %v1484_v49 = vadd.f32 %v1476_v39, %v3168_v25  ;;  %v1485_v19 = vadd.f32 %v1477_v62, %v3171_v31  ;;  %v1486_v54 = vadd.f32 %v1478_v5, %v3174_v1  ;;  %v3180_v7 = vsub.f32 %v3178_v37, %v3179_v8 }
 0x11f   : > { %v1487_v29 = vadd.f32 %v1479_v38, %v3177_v63  ;;  %v3183_v51 = vsub.f32 %v3181_v33, %v3182_v9  ;;  %1490 = vst [vmem:[%s619_s21] sm:$0xff] %v1482_v59  ;;  %1491 = vst [vmem:[%s619_s21 + $0x8] sm:$0xff] %v1483_v57  ;;  %v1506_v62 = vmul.f32 %v2833_v27, %v1424_v60 }
 0x120   : > { %v1488_v50 = vadd.f32 %v1480_v4, %v3180_v7  ;;  %1492 = vst [vmem:[%s619_s21 + $0x10] sm:$0xff] %v1484_v49  ;;  %1493 = vst [vmem:[%s619_s21 + $0x18] sm:$0xff] %v1485_v19  ;;  %v1507_v5 = vmul.f32 %v2843_v47, %v1425_v13  ;;  %v1509_v38 = vmul.f32 %v2849_v40, %v1427_v11 }
 0x121   : > { %v1489_v39 = vadd.f32 %v1481_v21, %v3183_v51  ;;  %1494 = vst [vmem:[%s619_s21 + $0x20] sm:$0xff] %v1486_v54  ;;  %1495 = vst [vmem:[%s619_s21 + $0x28] sm:$0xff] %v1487_v29  ;;  %v1510_v4 = vmul.f32 %v2857_v35, %v1428_v15  ;;  %v1511_v21 = vmul.f32 %v2860_v30, %v1429_v3  ;;  %v3189_v3 = vld [vmem:[#allocation57_spill] sm:$0xff] }
 0x122   : > { %1496 = vst [vmem:[%s619_s21 + $0x30] sm:$0xff] %v1488_v50  ;;  %v1512_v59 = vmul.f32 %v2863_v45, %v1430_v10  ;;  %v1513_v57 = vmul.f32 %v2870_v48, %v1431_v18  ;;  %v1514_v27 = vmul.f32 %v2873_v43, %v2813_v55  ;;  %v1515_v47 = vmul.f32 %v2876_v46, %v2816_v32  ;;  %v3190_v18 = vld [vmem:[#allocation58_spill] sm:$0xff] }
 0x123   : > { %1497 = vst [vmem:[%s619_s21 + $0x38] sm:$0xff] %v1489_v39  ;;  %v1516_v41 = vmul.f32 %v1882_v56, %v2818_v58  ;;  %v1517_v40 = vmul.f32 %v1883_v26, %v2821_v28  ;;  %v1518_v60 = vmul.f32 %v1884_v61, %v2824_v14  ;;  %v1519_v35 = vmul.f32 %v1885_v0, %v2828_v6  ;;  %v3184_v14 = vld [vmem:[#allocation52_spill] sm:$0xff]  ;;  %v3185_v6 = vld [vmem:[#allocation53_spill] sm:$0xff] }
 0x124   : > { %v1520_v30 = vmul.f32 %v1886_v44, %v2835_v20  ;;  %v1521_v45 = vmul.f32 %v1887_v23, %v2851_v36  ;;  %v1522_v13 = vadd.f32 %v1514_v27, %v1506_v62  ;;  %v1523_v48 = vadd.f32 %v1515_v47, %v1507_v5  ;;  %v3186_v20 = vld [vmem:[#allocation54_spill] sm:$0xff]  ;;  %v3187_v36 = vld [vmem:[#allocation55_spill] sm:$0xff]  ;;  %v3188_v61 = vld [vmem:[#allocation56_spill] sm:$0xff] }
 0x125   : > { %v1524_v12 = vadd.f32 %v1516_v41, %v1508_v2  ;;  %v1525_v11 = vadd.f32 %v1517_v40, %v1509_v38  ;;  %v1526_v55 = vadd.f32 %v1518_v60, %v1510_v4  ;;  %v1527_v32 = vadd.f32 %v1519_v35, %v1511_v21  ;;  %v3191_v44 = vld [vmem:[#allocation59_spill] sm:$0xff] }
 0x126   : > { %v1528_v58 = vadd.f32 %v1520_v30, %v1512_v59  ;;  %v1529_v28 = vadd.f32 %v1521_v45, %v1513_v57  ;;  %v1530_v43 = vadd.f32 %v1522_v13, %v3184_v14  ;;  %v1531_v46 = vadd.f32 %v1523_v48, %v3185_v6 }
 0x127   : > { %v1532_v56 = vadd.f32 %v1524_v12, %v3186_v20  ;;  %v1533_v26 = vadd.f32 %v1525_v11, %v3187_v36  ;;  %v1534_v15 = vadd.f32 %v1526_v55, %v3188_v61  ;;  %v1535_v10 = vadd.f32 %v1527_v32, %v3189_v3 }
 0x128   : > { %v1536_v0 = vadd.f32 %v1528_v58, %v3190_v18  ;;  %v1537_v23 = vadd.f32 %v1529_v28, %v3191_v44  ;;  %1538 = vst [vmem:[%s632_s23] sm:$0xff] %v1530_v43  ;;  %1539 = vst [vmem:[%s632_s23 + $0x8] sm:$0xff] %v1531_v46 }
 0x129   : > { %1540 = vst [vmem:[%s632_s23 + $0x10] sm:$0xff] %v1532_v56  ;;  %1541 = vst [vmem:[%s632_s23 + $0x18] sm:$0xff] %v1533_v26 }
 0x12a   : > { %1542 = vst [vmem:[%s632_s23 + $0x20] sm:$0xff] %v1534_v15  ;;  %1543 = vst [vmem:[%s632_s23 + $0x28] sm:$0xff] %v1535_v10 }
 0x12b   : > { %1544 = vst [vmem:[%s632_s23 + $0x30] sm:$0xff] %v1536_v0  ;;  %1545 = vst [vmem:[%s632_s23 + $0x38] sm:$0xff] %v1537_v23 }
 0x12c PF: > { %s20_s13 = sadd.s32 1, %s2008_s13   ;;  %s3192_s30 = smov %s2000_s11 }
 0x12d   : > { %p17_p7 = scmp.ge.s32.totalorder %s20_s13, 8   ;;  %s3193_s10 = smov %s2004_s12 }
 0x12e   : > { %s3194_s11 = smov %s3197_s14  ;;  %s3195_s12 = smov %s3201_s15 }
 0x12f   :  { %19 = sbr.rel (!%p17_p7) target bundleno = 3 (0x3), region = 115 }

</bundles_post_ra>
